<compile_context>
chip_gen: v7x
topology: tpu7x:2x2x1
jax: 0.10.0
libtpu: 0.0.40
codegen_flags: <defaults>
</compile_context>

<pallas_src>
import functools

import jax
import jax.numpy as jnp
from jax.experimental import pallas as pl
from jax.experimental.pallas import tpu as pltpu


CFG = dict(
    vocab_size=100,
    max_position=32,
    type_vocab=2,
    hidden=32,
    num_heads=2,
    num_layers=2,
    intermediate=64,
    num_labels=6,
)

LANE = 128                      # lane-dense padded classifier width
_SQRT1_2 = 0.7071067811865476   # 1/sqrt(2) for exact (erf) GELU


# ----------------------------------------------------------------------------
# Fused whole-model Pallas kernel (single grid step, whole batch resident)
# ----------------------------------------------------------------------------

def _bert_fused_kernel(
    emb_ref, bias_ref,
    embg_ref, embb_ref,
    wqkv_ref, bqkv_ref, wo_ref, bo_ref, ln1g_ref, ln1b_ref,
    w1_ref, b1_ref, w2_ref, b2_ref, ln2g_ref, ln2b_ref,
    wp_ref, bp_ref, wc_ref, bc_ref,
    out_ref,
    *, num_layers, num_heads, eps):
    """Full BERT-multilabel forward for the whole (small) batch, VMEM-resident."""
    B, S, H = emb_ref.shape
    dH = H // num_heads
    scale = 1.0 / (dH ** 0.5)
    BS = B * S

    def mm(a, b):
        # Activations cast to bf16 for the MXU; weights are already bf16-at-rest.
        return jnp.dot(a.astype(jnp.bfloat16), b, preferred_element_type=jnp.float32)

    def layernorm(x, g, b):
        mu = jnp.mean(x, axis=-1, keepdims=True)
        var = jnp.mean((x - mu) ** 2, axis=-1, keepdims=True)
        return (x - mu) * jax.lax.rsqrt(var + eps) * g + b

    # embeddings LayerNorm; batch folded into rows (B*S sublanes).
    # (embedding dropout is eval-mode identity)
    h = layernorm(emb_ref[...].reshape(BS, H), embg_ref[...], embb_ref[...])  # [BS, H]
    mask_bias = bias_ref[...]                                   # [B, 1, S] additive

    for l in range(num_layers):
        x = h                                                   # residual input [BS, H]

        # fused Q/K/V projection: one [BS,H] x [H,3H] matmul
        qkv = mm(x, wqkv_ref[l]) + bqkv_ref[l]                  # [BS, 3H] f32

        # attention, batched over B per head; single output projection per layer
        heads_ctx = []
        for hd in range(num_heads):
            lo = hd * dH
            qh = qkv[:, lo:lo + dH].reshape(B, S, dH)
            kh = qkv[:, H + lo:H + lo + dH].reshape(B, S, dH)
            vh = qkv[:, 2 * H + lo:2 * H + lo + dH].reshape(B, S, dH)
            s = jnp.einsum('bqd,bkd->bqk',
                           qh.astype(jnp.bfloat16), kh.astype(jnp.bfloat16),
                           preferred_element_type=jnp.float32)  # [B, S, S]
            s = s * scale + mask_bias
            s = s - jnp.max(s, axis=-1, keepdims=True)
            p = jnp.exp(s)
            p = p * pl.reciprocal(jnp.sum(p, axis=-1, keepdims=True), approx=True)
            ctx = jnp.einsum('bqk,bkd->bqd',
                             p.astype(jnp.bfloat16), vh.astype(jnp.bfloat16),
                             preferred_element_type=jnp.float32)  # [B, S, dH]
            heads_ctx.append(ctx)
        ctx_all = jnp.concatenate(heads_ctx, axis=-1).reshape(BS, H)   # [BS, H]
        attn = mm(ctx_all, wo_ref[l]) + bo_ref[l]                      # one [H,H] proj
        h = layernorm(attn + x, ln1g_ref[l], ln1b_ref[l])

        # feed-forward
        inter = mm(h, w1_ref[l]) + b1_ref[l]                           # [BS, I]
        inter = 0.5 * inter * (1.0 + jax.lax.erf(inter * _SQRT1_2))    # exact GELU
        ffn = mm(inter, w2_ref[l]) + b2_ref[l]                         # [BS, H]
        h = layernorm(ffn + h, ln2g_ref[l], ln2b_ref[l])

    # pooler: outputs[1] = tanh(dense(hidden[:, 0])); dropout = eval identity
    cls = h.reshape(B, S, H)[:, 0, :]                            # [B, H] CLS rows
    pooled = jnp.tanh(mm(cls, wp_ref[...]) + bp_ref[...])        # [B, H]

    # classifier into a lane-dense padded [B, 128] slab (sliced in wrapper)
    logits = mm(pooled, wc_ref[...]) + bc_ref[...]               # [B, LANE]
    out_ref[...] = logits.astype(out_ref.dtype)


# ----------------------------------------------------------------------------
# Parameter init (synthetic) + one-time packing for the fused kernel
# ----------------------------------------------------------------------------

def init_params(key, cfg):
    H, I = cfg["hidden"], cfg["intermediate"]
    keys = iter(jax.random.split(key, 64))

    def w(shape, scale=0.02):
        return (scale * jax.random.normal(next(keys), shape)).astype(jnp.float32)

    params = {
        "word_emb": w((cfg["vocab_size"], H)),
        "pos_emb": w((cfg["max_position"], H)),
        "type_emb": w((cfg["type_vocab"], H)),
        "emb_ln_g": jnp.ones((H,), jnp.float32),
        "emb_ln_b": jnp.zeros((H,), jnp.float32),
        "layers": [],
        # pooler
        "wp": w((H, H)), "bp": jnp.zeros((H,), jnp.float32),
        # classifier (nn.Linear(hidden_size, num_labels)) stored as [in, out]
        "wc": w((H, cfg["num_labels"])),
        "bc": jnp.zeros((cfg["num_labels"],), jnp.float32),
    }
    for _ in range(cfg["num_layers"]):
        params["layers"].append({
            "wq": w((H, H)), "bq": jnp.zeros((H,), jnp.float32),
            "wk": w((H, H)), "bk": jnp.zeros((H,), jnp.float32),
            "wv": w((H, H)), "bv": jnp.zeros((H,), jnp.float32),
            "wo": w((H, H)), "bo": jnp.zeros((H,), jnp.float32),
            "ln1_g": jnp.ones((H,), jnp.float32), "ln1_b": jnp.zeros((H,), jnp.float32),
            "w1": w((H, I)), "b1": jnp.zeros((I,), jnp.float32),
            "w2": w((I, H)), "b2": jnp.zeros((H,), jnp.float32),
            "ln2_g": jnp.ones((H,), jnp.float32), "ln2_b": jnp.zeros((H,), jnp.float32),
        })
    return params


def pack_params(params, cfg):
    """One-time (outside jit): stack per-layer params, fuse Q/K/V, pad classifier.

    MXU weight operands are stored bf16-at-rest; biases / LayerNorm params stay
    f32 (they feed f32 elementwise math).
    """
    H, I = cfg["hidden"], cfg["intermediate"]
    NL = cfg["num_labels"]
    ls = params["layers"]
    bf16 = jnp.bfloat16

    def stack(fn, dtype=jnp.float32):
        return jnp.stack([fn(l) for l in ls], axis=0).astype(dtype)

    wc_pad = jnp.zeros((H, LANE), jnp.float32).at[:, :NL].set(params["wc"])
    bc_pad = jnp.zeros((1, LANE), jnp.float32).at[0, :NL].set(params["bc"])

    return {
        # embedding tables stay f32 (gathered in plain-JAX glue)
        "word_emb": params["word_emb"],
        "pos_emb": params["pos_emb"],
        "type_emb": params["type_emb"],
        "emb_ln_g": params["emb_ln_g"].reshape(1, H),
        "emb_ln_b": params["emb_ln_b"].reshape(1, H),
        "wqkv": stack(lambda l: jnp.concatenate([l["wq"], l["wk"], l["wv"]], axis=1), bf16),
        "bqkv": stack(lambda l: jnp.concatenate([l["bq"], l["bk"], l["bv"]]).reshape(1, 3 * H)),
        "wo": stack(lambda l: l["wo"], bf16),
        "bo": stack(lambda l: l["bo"].reshape(1, H)),
        "ln1_g": stack(lambda l: l["ln1_g"].reshape(1, H)),
        "ln1_b": stack(lambda l: l["ln1_b"].reshape(1, H)),
        "w1": stack(lambda l: l["w1"], bf16),
        "b1": stack(lambda l: l["b1"].reshape(1, I)),
        "w2": stack(lambda l: l["w2"], bf16),
        "b2": stack(lambda l: l["b2"].reshape(1, H)),
        "ln2_g": stack(lambda l: l["ln2_g"].reshape(1, H)),
        "ln2_b": stack(lambda l: l["ln2_b"].reshape(1, H)),
        "wp": params["wp"].astype(bf16),
        "bp": params["bp"].reshape(1, H),
        "wc_pad": wc_pad.astype(bf16),
        "bc_pad": bc_pad,
    }


# ----------------------------------------------------------------------------
# Forward (jitted): embedding gather in plain JAX, one fused pallas_call
# ----------------------------------------------------------------------------

def bert_multilabel_forward(packed, text_ids, attention_mask, cfg):
    B, S = text_ids.shape
    H, I = cfg["hidden"], cfg["intermediate"]
    L, nH, NL = cfg["num_layers"], cfg["num_heads"], cfg["num_labels"]

    # ---- embeddings (gather = glue in plain JAX) ----
    pos_ids = jnp.arange(S, dtype=jnp.int32)[None, :]
    tok_type = jnp.zeros_like(text_ids)
    emb = (packed["word_emb"][text_ids]
           + packed["pos_emb"][pos_ids]
           + packed["type_emb"][tok_type])                               # [B, S, H] f32
    mask_bias = ((1.0 - attention_mask.astype(jnp.float32)) * -1e9)[:, None, :]  # [B,1,S]
    # TODO(synk): embedding / hidden / pooler dropout omitted (eval-mode identity).

    f3 = lambda shape: pl.BlockSpec(shape, lambda i: (0, 0, 0))
    f2 = lambda shape: pl.BlockSpec(shape, lambda i: (0, 0))

    out = pl.pallas_call(
        functools.partial(_bert_fused_kernel,
                          num_layers=L, num_heads=nH, eps=1e-12),
        out_shape=jax.ShapeDtypeStruct((B, LANE), jnp.float32),
        grid=(1,),                                      # whole batch in one step
        in_specs=[
            f3((B, S, H)),                              # embeddings (whole batch)
            f3((B, 1, S)),                              # additive mask bias
            f2((1, H)), f2((1, H)),                     # embedding LayerNorm
            f3((L, H, 3 * H)), f3((L, 1, 3 * H)),       # fused QKV proj (bf16)
            f3((L, H, H)), f3((L, 1, H)),               # attention out proj
            f3((L, 1, H)), f3((L, 1, H)),               # LN1
            f3((L, H, I)), f3((L, 1, I)),               # FFN up
            f3((L, I, H)), f3((L, 1, H)),               # FFN down
            f3((L, 1, H)), f3((L, 1, H)),               # LN2
            f2((H, H)), f2((1, H)),                     # pooler
            f2((H, LANE)), f2((1, LANE)),               # classifier (lane-padded)
        ],
        out_specs=pl.BlockSpec((B, LANE), lambda i: (0, 0)),
        compiler_params=pltpu.CompilerParams(
            dimension_semantics=("arbitrary",)),
    )(emb, mask_bias,
      packed["emb_ln_g"], packed["emb_ln_b"],
      packed["wqkv"], packed["bqkv"], packed["wo"], packed["bo"],
      packed["ln1_g"], packed["ln1_b"],
      packed["w1"], packed["b1"], packed["w2"], packed["b2"],
      packed["ln2_g"], packed["ln2_b"],
      packed["wp"], packed["bp"], packed["wc_pad"], packed["bc_pad"])

    return out[:, :NL]                                   # [B, num_labels]


# ----------------------------------------------------------------------------
# Main
# ----------------------------------------------------------------------------

if __name__ == "__main__":
    key = jax.random.PRNGKey(0)
    k_param, k_ids = jax.random.split(key)

    B, S = 2, 8
    params = init_params(k_param, CFG)
    packed = pack_params(params, CFG)   # one-time packing, outside jit

    text_ids = jax.random.randint(k_ids, (B, S), 0, CFG["vocab_size"], dtype=jnp.int32)
    attention_mask = jnp.array(
        [[1, 1, 1, 1, 1, 1, 1, 1],
         [1, 1, 1, 1, 1, 0, 0, 0]], dtype=jnp.int32)

    fwd = jax.jit(functools.partial(bert_multilabel_forward, cfg=CFG))
    logits = fwd(packed, text_ids, attention_mask)
    logits = jax.block_until_ready(logits)

    assert logits.shape == (B, CFG["num_labels"])
    assert logits.dtype == jnp.float32
    assert bool(jnp.all(jnp.isfinite(logits)))
    print("KERNEL_OK")
</pallas_src>

<mosaic_0001>
module attributes {stable_mosaic.version = 11 : i64} {
  func.func @_bert_fused_kernel(%arg0: i32, %arg1: memref<2x8x32xf32, #tpu.memory_space<vmem>>, %arg2: memref<2x1x8xf32, #tpu.memory_space<vmem>>, %arg3: memref<1x32xf32, #tpu.memory_space<vmem>>, %arg4: memref<1x32xf32, #tpu.memory_space<vmem>>, %arg5: memref<2x32x96xbf16, #tpu.memory_space<vmem>>, %arg6: memref<2x1x96xf32, #tpu.memory_space<vmem>>, %arg7: memref<2x32x32xbf16, #tpu.memory_space<vmem>>, %arg8: memref<2x1x32xf32, #tpu.memory_space<vmem>>, %arg9: memref<2x1x32xf32, #tpu.memory_space<vmem>>, %arg10: memref<2x1x32xf32, #tpu.memory_space<vmem>>, %arg11: memref<2x32x64xbf16, #tpu.memory_space<vmem>>, %arg12: memref<2x1x64xf32, #tpu.memory_space<vmem>>, %arg13: memref<2x64x32xbf16, #tpu.memory_space<vmem>>, %arg14: memref<2x1x32xf32, #tpu.memory_space<vmem>>, %arg15: memref<2x1x32xf32, #tpu.memory_space<vmem>>, %arg16: memref<2x1x32xf32, #tpu.memory_space<vmem>>, %arg17: memref<32x32xbf16, #tpu.memory_space<vmem>>, %arg18: memref<1x32xf32, #tpu.memory_space<vmem>>, %arg19: memref<32x128xbf16, #tpu.memory_space<vmem>>, %arg20: memref<1x128xf32, #tpu.memory_space<vmem>>, %arg21: memref<2x128xf32, #tpu.memory_space<vmem>>) attributes {dimension_semantics = [#tpu.dimension_semantics<arbitrary>], iteration_bounds = array<i64: 1>, scalar_prefetch = 0 : i64, scratch_operands = 0 : i64, tpu.core_type = #tpu.core_type<tc>, window_params = [{pipeline_mode = #tpu.pipeline_mode<synchronous>, transform_indices = @transform_0, window_bounds = array<i64: 2, 8, 32>}, {pipeline_mode = #tpu.pipeline_mode<synchronous>, transform_indices = @transform_1, window_bounds = array<i64: 2, 1, 8>}, {pipeline_mode = #tpu.pipeline_mode<synchronous>, transform_indices = @transform_2, window_bounds = array<i64: 1, 32>}, {pipeline_mode = #tpu.pipeline_mode<synchronous>, transform_indices = @transform_3, window_bounds = array<i64: 1, 32>}, {pipeline_mode = #tpu.pipeline_mode<synchronous>, transform_indices = @transform_4, window_bounds = array<i64: 2, 32, 96>}, {pipeline_mode = #tpu.pipeline_mode<synchronous>, transform_indices = @transform_5, window_bounds = array<i64: 2, 1, 96>}, {pipeline_mode = #tpu.pipeline_mode<synchronous>, transform_indices = @transform_6, window_bounds = array<i64: 2, 32, 32>}, {pipeline_mode = #tpu.pipeline_mode<synchronous>, transform_indices = @transform_7, window_bounds = array<i64: 2, 1, 32>}, {pipeline_mode = #tpu.pipeline_mode<synchronous>, transform_indices = @transform_8, window_bounds = array<i64: 2, 1, 32>}, {pipeline_mode = #tpu.pipeline_mode<synchronous>, transform_indices = @transform_9, window_bounds = array<i64: 2, 1, 32>}, {pipeline_mode = #tpu.pipeline_mode<synchronous>, transform_indices = @transform_10, window_bounds = array<i64: 2, 32, 64>}, {pipeline_mode = #tpu.pipeline_mode<synchronous>, transform_indices = @transform_11, window_bounds = array<i64: 2, 1, 64>}, {pipeline_mode = #tpu.pipeline_mode<synchronous>, transform_indices = @transform_12, window_bounds = array<i64: 2, 64, 32>}, {pipeline_mode = #tpu.pipeline_mode<synchronous>, transform_indices = @transform_13, window_bounds = array<i64: 2, 1, 32>}, {pipeline_mode = #tpu.pipeline_mode<synchronous>, transform_indices = @transform_14, window_bounds = array<i64: 2, 1, 32>}, {pipeline_mode = #tpu.pipeline_mode<synchronous>, transform_indices = @transform_15, window_bounds = array<i64: 2, 1, 32>}, {pipeline_mode = #tpu.pipeline_mode<synchronous>, transform_indices = @transform_16, window_bounds = array<i64: 32, 32>}, {pipeline_mode = #tpu.pipeline_mode<synchronous>, transform_indices = @transform_17, window_bounds = array<i64: 1, 32>}, {pipeline_mode = #tpu.pipeline_mode<synchronous>, transform_indices = @transform_18, window_bounds = array<i64: 32, 128>}, {pipeline_mode = #tpu.pipeline_mode<synchronous>, transform_indices = @transform_19, window_bounds = array<i64: 1, 128>}, {pipeline_mode = #tpu.pipeline_mode<synchronous>, transform_indices = @transform_20, window_bounds = array<i64: 2, 128>}]} {
    %c0 = arith.constant 0 : index
    %c0_0 = arith.constant 0 : index
    %c0_1 = arith.constant 0 : index
    %0 = vector.load %arg1[%c0, %c0_0, %c0_1] : memref<2x8x32xf32, #tpu.memory_space<vmem>>, vector<2x8x32xf32>
    %1 = vector.shape_cast %0 : vector<2x8x32xf32> to vector<16x32xf32>
    %c0_2 = arith.constant 0 : index
    %c0_3 = arith.constant 0 : index
    %2 = vector.load %arg3[%c0_2, %c0_3] : memref<1x32xf32, #tpu.memory_space<vmem>>, vector<1x32xf32>
    %c0_4 = arith.constant 0 : index
    %c0_5 = arith.constant 0 : index
    %3 = vector.load %arg4[%c0_4, %c0_5] : memref<1x32xf32, #tpu.memory_space<vmem>>, vector<1x32xf32>
    %cst = arith.constant dense<0.000000e+00> : vector<16xf32>
    %4 = vector.multi_reduction <add>, %1, %cst [1] : vector<16x32xf32> to vector<16xf32>
    %5 = vector.shape_cast %4 : vector<16xf32> to vector<16x1xf32>
    %cst_6 = arith.constant 3.200000e+01 : f32
    %6 = vector.broadcast %cst_6 : f32 to vector<16x1xf32>
    %7 = arith.divf %5, %6 : vector<16x1xf32>
    %8 = vector.broadcast %7 : vector<16x1xf32> to vector<16x32xf32>
    %9 = arith.subf %1, %8 : vector<16x32xf32>
    %10 = arith.mulf %9, %9 : vector<16x32xf32>
    %cst_7 = arith.constant dense<0.000000e+00> : vector<16xf32>
    %11 = vector.multi_reduction <add>, %10, %cst_7 [1] : vector<16x32xf32> to vector<16xf32>
    %12 = vector.shape_cast %11 : vector<16xf32> to vector<16x1xf32>
    %cst_8 = arith.constant 3.200000e+01 : f32
    %13 = vector.broadcast %cst_8 : f32 to vector<16x1xf32>
    %14 = arith.divf %12, %13 : vector<16x1xf32>
    %15 = vector.broadcast %7 : vector<16x1xf32> to vector<16x32xf32>
    %16 = arith.subf %1, %15 : vector<16x32xf32>
    %cst_9 = arith.constant 9.99999996E-13 : f32
    %17 = vector.broadcast %cst_9 : f32 to vector<16x1xf32>
    %18 = arith.addf %14, %17 : vector<16x1xf32>
    %19 = math.rsqrt %18 : vector<16x1xf32>
    %20 = vector.broadcast %19 : vector<16x1xf32> to vector<16x32xf32>
    %21 = arith.mulf %16, %20 : vector<16x32xf32>
    %22 = vector.broadcast %2 : vector<1x32xf32> to vector<16x32xf32>
    %23 = arith.mulf %21, %22 : vector<16x32xf32>
    %24 = vector.broadcast %3 : vector<1x32xf32> to vector<16x32xf32>
    %25 = arith.addf %23, %24 : vector<16x32xf32>
    %c0_10 = arith.constant 0 : index
    %c0_11 = arith.constant 0 : index
    %c0_12 = arith.constant 0 : index
    %26 = vector.load %arg2[%c0_10, %c0_11, %c0_12] : memref<2x1x8xf32, #tpu.memory_space<vmem>>, vector<2x1x8xf32>
    %c0_13 = arith.constant 0 : index
    %c0_14 = arith.constant 0 : index
    %c0_15 = arith.constant 0 : index
    %27 = vector.load %arg5[%c0_13, %c0_14, %c0_15] : memref<2x32x96xbf16, #tpu.memory_space<vmem>>, vector<1x32x96xbf16>
    %28 = vector.shape_cast %27 : vector<1x32x96xbf16> to vector<32x96xbf16>
    %29 = arith.truncf %25 : vector<16x32xf32> to vector<16x32xbf16>
    %cst_16 = arith.constant dense<0.000000e+00> : vector<16x96xf32>
    %30 = tpu.matmul %29, %28, %cst_16 {dimension_numbers = #tpu.dot_dimension_numbers<[1], [0], [0], [1], [0, 0, 1, 1], [], []>} : vector<16x32xbf16>, vector<32x96xbf16>, vector<16x96xf32> -> vector<16x96xf32>
    %c0_17 = arith.constant 0 : index
    %c0_18 = arith.constant 0 : index
    %c0_19 = arith.constant 0 : index
    %31 = vector.load %arg6[%c0_17, %c0_18, %c0_19] : memref<2x1x96xf32, #tpu.memory_space<vmem>>, vector<1x1x96xf32>
    %32 = vector.shape_cast %31 : vector<1x1x96xf32> to vector<1x96xf32>
    %33 = vector.broadcast %32 : vector<1x96xf32> to vector<16x96xf32>
    %34 = arith.addf %30, %33 : vector<16x96xf32>
    %35 = vector.extract_strided_slice %34 {offsets = [0, 0], sizes = [16, 16], strides = [1, 1]} : vector<16x96xf32> to vector<16x16xf32>
    %36 = vector.shape_cast %35 : vector<16x16xf32> to vector<2x8x16xf32>
    %37 = vector.extract_strided_slice %34 {offsets = [0, 32], sizes = [16, 16], strides = [1, 1]} : vector<16x96xf32> to vector<16x16xf32>
    %38 = vector.shape_cast %37 : vector<16x16xf32> to vector<2x8x16xf32>
    %39 = vector.extract_strided_slice %34 {offsets = [0, 64], sizes = [16, 16], strides = [1, 1]} : vector<16x96xf32> to vector<16x16xf32>
    %40 = vector.shape_cast %39 : vector<16x16xf32> to vector<2x8x16xf32>
    %41 = arith.truncf %36 : vector<2x8x16xf32> to vector<2x8x16xbf16>
    %42 = arith.truncf %38 : vector<2x8x16xf32> to vector<2x8x16xbf16>
    "tpu.trace_start"() <{level = 10 : i32, message = "bqd,bkd->bqk"}> : () -> ()
    %cst_20 = arith.constant dense<0.000000e+00> : vector<2x8x8xf32>
    %43 = tpu.matmul %41, %42, %cst_20 {dimension_numbers = #tpu.dot_dimension_numbers<[2], [2], [1], [1], [0, 0, 0, 1, 1, 1], [0], [0]>} : vector<2x8x16xbf16>, vector<2x8x16xbf16>, vector<2x8x8xf32> -> vector<2x8x8xf32>
    "tpu.trace_stop"() : () -> ()
    %cst_21 = arith.constant 2.500000e-01 : f32
    %44 = vector.broadcast %cst_21 : f32 to vector<2x8x8xf32>
    %45 = arith.mulf %43, %44 : vector<2x8x8xf32>
    %46 = vector.broadcast %26 : vector<2x1x8xf32> to vector<2x8x8xf32>
    %47 = arith.addf %45, %46 : vector<2x8x8xf32>
    %cst_22 = arith.constant dense<0xFF800000> : vector<2x8xf32>
    %48 = vector.multi_reduction <maximumf>, %47, %cst_22 [2] : vector<2x8x8xf32> to vector<2x8xf32>
    %49 = vector.shape_cast %48 : vector<2x8xf32> to vector<2x8x1xf32>
    %50 = vector.broadcast %49 : vector<2x8x1xf32> to vector<2x8x8xf32>
    %51 = arith.subf %47, %50 : vector<2x8x8xf32>
    %52 = math.exp %51 : vector<2x8x8xf32>
    %cst_23 = arith.constant dense<0.000000e+00> : vector<2x8xf32>
    %53 = vector.multi_reduction <add>, %52, %cst_23 [2] : vector<2x8x8xf32> to vector<2x8xf32>
    %54 = vector.shape_cast %53 : vector<2x8xf32> to vector<2x8x1xf32>
    %55 = tpu.reciprocal %54 {approx = true} : vector<2x8x1xf32> -> vector<2x8x1xf32>
    %56 = vector.broadcast %55 : vector<2x8x1xf32> to vector<2x8x8xf32>
    %57 = arith.mulf %52, %56 : vector<2x8x8xf32>
    %58 = arith.truncf %57 : vector<2x8x8xf32> to vector<2x8x8xbf16>
    %59 = arith.truncf %40 : vector<2x8x16xf32> to vector<2x8x16xbf16>
    "tpu.trace_start"() <{level = 10 : i32, message = "bqk,bkd->bqd"}> : () -> ()
    %cst_24 = arith.constant dense<0.000000e+00> : vector<2x8x16xf32>
    %60 = tpu.matmul %58, %59, %cst_24 {dimension_numbers = #tpu.dot_dimension_numbers<[2], [1], [1], [2], [0, 0, 0, 1, 1, 2], [0], [0]>} : vector<2x8x8xbf16>, vector<2x8x16xbf16>, vector<2x8x16xf32> -> vector<2x8x16xf32>
    "tpu.trace_stop"() : () -> ()
    %61 = vector.extract_strided_slice %34 {offsets = [0, 16], sizes = [16, 16], strides = [1, 1]} : vector<16x96xf32> to vector<16x16xf32>
    %62 = vector.shape_cast %61 : vector<16x16xf32> to vector<2x8x16xf32>
    %63 = vector.extract_strided_slice %34 {offsets = [0, 48], sizes = [16, 16], strides = [1, 1]} : vector<16x96xf32> to vector<16x16xf32>
    %64 = vector.shape_cast %63 : vector<16x16xf32> to vector<2x8x16xf32>
    %65 = vector.extract_strided_slice %34 {offsets = [0, 80], sizes = [16, 16], strides = [1, 1]} : vector<16x96xf32> to vector<16x16xf32>
    %66 = vector.shape_cast %65 : vector<16x16xf32> to vector<2x8x16xf32>
    %67 = arith.truncf %62 : vector<2x8x16xf32> to vector<2x8x16xbf16>
    %68 = arith.truncf %64 : vector<2x8x16xf32> to vector<2x8x16xbf16>
    "tpu.trace_start"() <{level = 10 : i32, message = "bqd,bkd->bqk"}> : () -> ()
    %cst_25 = arith.constant dense<0.000000e+00> : vector<2x8x8xf32>
    %69 = tpu.matmul %67, %68, %cst_25 {dimension_numbers = #tpu.dot_dimension_numbers<[2], [2], [1], [1], [0, 0, 0, 1, 1, 1], [0], [0]>} : vector<2x8x16xbf16>, vector<2x8x16xbf16>, vector<2x8x8xf32> -> vector<2x8x8xf32>
    "tpu.trace_stop"() : () -> ()
    %cst_26 = arith.constant 2.500000e-01 : f32
    %70 = vector.broadcast %cst_26 : f32 to vector<2x8x8xf32>
    %71 = arith.mulf %69, %70 : vector<2x8x8xf32>
    %72 = vector.broadcast %26 : vector<2x1x8xf32> to vector<2x8x8xf32>
    %73 = arith.addf %71, %72 : vector<2x8x8xf32>
    %cst_27 = arith.constant dense<0xFF800000> : vector<2x8xf32>
    %74 = vector.multi_reduction <maximumf>, %73, %cst_27 [2] : vector<2x8x8xf32> to vector<2x8xf32>
    %75 = vector.shape_cast %74 : vector<2x8xf32> to vector<2x8x1xf32>
    %76 = vector.broadcast %75 : vector<2x8x1xf32> to vector<2x8x8xf32>
    %77 = arith.subf %73, %76 : vector<2x8x8xf32>
    %78 = math.exp %77 : vector<2x8x8xf32>
    %cst_28 = arith.constant dense<0.000000e+00> : vector<2x8xf32>
    %79 = vector.multi_reduction <add>, %78, %cst_28 [2] : vector<2x8x8xf32> to vector<2x8xf32>
    %80 = vector.shape_cast %79 : vector<2x8xf32> to vector<2x8x1xf32>
    %81 = tpu.reciprocal %80 {approx = true} : vector<2x8x1xf32> -> vector<2x8x1xf32>
    %82 = vector.broadcast %81 : vector<2x8x1xf32> to vector<2x8x8xf32>
    %83 = arith.mulf %78, %82 : vector<2x8x8xf32>
    %84 = arith.truncf %83 : vector<2x8x8xf32> to vector<2x8x8xbf16>
    %85 = arith.truncf %66 : vector<2x8x16xf32> to vector<2x8x16xbf16>
    "tpu.trace_start"() <{level = 10 : i32, message = "bqk,bkd->bqd"}> : () -> ()
    %cst_29 = arith.constant dense<0.000000e+00> : vector<2x8x16xf32>
    %86 = tpu.matmul %84, %85, %cst_29 {dimension_numbers = #tpu.dot_dimension_numbers<[2], [1], [1], [2], [0, 0, 0, 1, 1, 2], [0], [0]>} : vector<2x8x8xbf16>, vector<2x8x16xbf16>, vector<2x8x16xf32> -> vector<2x8x16xf32>
    "tpu.trace_stop"() : () -> ()
    %87 = tpu.concatenate %60, %86 in 2 : vector<2x8x16xf32>, vector<2x8x16xf32> -> vector<2x8x32xf32>
    %88 = vector.shape_cast %87 : vector<2x8x32xf32> to vector<16x32xf32>
    %c0_30 = arith.constant 0 : index
    %c0_31 = arith.constant 0 : index
    %c0_32 = arith.constant 0 : index
    %89 = vector.load %arg7[%c0_30, %c0_31, %c0_32] : memref<2x32x32xbf16, #tpu.memory_space<vmem>>, vector<1x32x32xbf16>
    %90 = vector.shape_cast %89 : vector<1x32x32xbf16> to vector<32x32xbf16>
    %91 = arith.truncf %88 : vector<16x32xf32> to vector<16x32xbf16>
    %cst_33 = arith.constant dense<0.000000e+00> : vector<16x32xf32>
    %92 = tpu.matmul %91, %90, %cst_33 {dimension_numbers = #tpu.dot_dimension_numbers<[1], [0], [0], [1], [0, 0, 1, 1], [], []>} : vector<16x32xbf16>, vector<32x32xbf16>, vector<16x32xf32> -> vector<16x32xf32>
    %c0_34 = arith.constant 0 : index
    %c0_35 = arith.constant 0 : index
    %c0_36 = arith.constant 0 : index
    %93 = vector.load %arg8[%c0_34, %c0_35, %c0_36] : memref<2x1x32xf32, #tpu.memory_space<vmem>>, vector<1x1x32xf32>
    %94 = vector.shape_cast %93 : vector<1x1x32xf32> to vector<1x32xf32>
    %95 = vector.broadcast %94 : vector<1x32xf32> to vector<16x32xf32>
    %96 = arith.addf %92, %95 : vector<16x32xf32>
    %97 = arith.addf %96, %25 : vector<16x32xf32>
    %c0_37 = arith.constant 0 : index
    %c0_38 = arith.constant 0 : index
    %c0_39 = arith.constant 0 : index
    %98 = vector.load %arg9[%c0_37, %c0_38, %c0_39] : memref<2x1x32xf32, #tpu.memory_space<vmem>>, vector<1x1x32xf32>
    %99 = vector.shape_cast %98 : vector<1x1x32xf32> to vector<1x32xf32>
    %c0_40 = arith.constant 0 : index
    %c0_41 = arith.constant 0 : index
    %c0_42 = arith.constant 0 : index
    %100 = vector.load %arg10[%c0_40, %c0_41, %c0_42] : memref<2x1x32xf32, #tpu.memory_space<vmem>>, vector<1x1x32xf32>
    %101 = vector.shape_cast %100 : vector<1x1x32xf32> to vector<1x32xf32>
    %cst_43 = arith.constant dense<0.000000e+00> : vector<16xf32>
    %102 = vector.multi_reduction <add>, %97, %cst_43 [1] : vector<16x32xf32> to vector<16xf32>
    %103 = vector.shape_cast %102 : vector<16xf32> to vector<16x1xf32>
    %cst_44 = arith.constant 3.200000e+01 : f32
    %104 = vector.broadcast %cst_44 : f32 to vector<16x1xf32>
    %105 = arith.divf %103, %104 : vector<16x1xf32>
    %106 = vector.broadcast %105 : vector<16x1xf32> to vector<16x32xf32>
    %107 = arith.subf %97, %106 : vector<16x32xf32>
    %108 = arith.mulf %107, %107 : vector<16x32xf32>
    %cst_45 = arith.constant dense<0.000000e+00> : vector<16xf32>
    %109 = vector.multi_reduction <add>, %108, %cst_45 [1] : vector<16x32xf32> to vector<16xf32>
    %110 = vector.shape_cast %109 : vector<16xf32> to vector<16x1xf32>
    %cst_46 = arith.constant 3.200000e+01 : f32
    %111 = vector.broadcast %cst_46 : f32 to vector<16x1xf32>
    %112 = arith.divf %110, %111 : vector<16x1xf32>
    %113 = vector.broadcast %105 : vector<16x1xf32> to vector<16x32xf32>
    %114 = arith.subf %97, %113 : vector<16x32xf32>
    %cst_47 = arith.constant 9.99999996E-13 : f32
    %115 = vector.broadcast %cst_47 : f32 to vector<16x1xf32>
    %116 = arith.addf %112, %115 : vector<16x1xf32>
    %117 = math.rsqrt %116 : vector<16x1xf32>
    %118 = vector.broadcast %117 : vector<16x1xf32> to vector<16x32xf32>
    %119 = arith.mulf %114, %118 : vector<16x32xf32>
    %120 = vector.broadcast %99 : vector<1x32xf32> to vector<16x32xf32>
    %121 = arith.mulf %119, %120 : vector<16x32xf32>
    %122 = vector.broadcast %101 : vector<1x32xf32> to vector<16x32xf32>
    %123 = arith.addf %121, %122 : vector<16x32xf32>
    %c0_48 = arith.constant 0 : index
    %c0_49 = arith.constant 0 : index
    %c0_50 = arith.constant 0 : index
    %124 = vector.load %arg11[%c0_48, %c0_49, %c0_50] : memref<2x32x64xbf16, #tpu.memory_space<vmem>>, vector<1x32x64xbf16>
    %125 = vector.shape_cast %124 : vector<1x32x64xbf16> to vector<32x64xbf16>
    %126 = arith.truncf %123 : vector<16x32xf32> to vector<16x32xbf16>
    %cst_51 = arith.constant dense<0.000000e+00> : vector<16x64xf32>
    %127 = tpu.matmul %126, %125, %cst_51 {dimension_numbers = #tpu.dot_dimension_numbers<[1], [0], [0], [1], [0, 0, 1, 1], [], []>} : vector<16x32xbf16>, vector<32x64xbf16>, vector<16x64xf32> -> vector<16x64xf32>
    %c0_52 = arith.constant 0 : index
    %c0_53 = arith.constant 0 : index
    %c0_54 = arith.constant 0 : index
    %128 = vector.load %arg12[%c0_52, %c0_53, %c0_54] : memref<2x1x64xf32, #tpu.memory_space<vmem>>, vector<1x1x64xf32>
    %129 = vector.shape_cast %128 : vector<1x1x64xf32> to vector<1x64xf32>
    %130 = vector.broadcast %129 : vector<1x64xf32> to vector<16x64xf32>
    %131 = arith.addf %127, %130 : vector<16x64xf32>
    %cst_55 = arith.constant 5.000000e-01 : f32
    %132 = vector.broadcast %cst_55 : f32 to vector<16x64xf32>
    %133 = arith.mulf %132, %131 : vector<16x64xf32>
    %cst_56 = arith.constant 0.707106769 : f32
    %134 = vector.broadcast %cst_56 : f32 to vector<16x64xf32>
    %135 = arith.mulf %131, %134 : vector<16x64xf32>
    %136 = math.erf %135 : vector<16x64xf32>
    %cst_57 = arith.constant 1.000000e+00 : f32
    %137 = vector.broadcast %cst_57 : f32 to vector<16x64xf32>
    %138 = arith.addf %137, %136 : vector<16x64xf32>
    %139 = arith.mulf %133, %138 : vector<16x64xf32>
    %c0_58 = arith.constant 0 : index
    %c0_59 = arith.constant 0 : index
    %c0_60 = arith.constant 0 : index
    %140 = vector.load %arg13[%c0_58, %c0_59, %c0_60] : memref<2x64x32xbf16, #tpu.memory_space<vmem>>, vector<1x64x32xbf16>
    %141 = vector.shape_cast %140 : vector<1x64x32xbf16> to vector<64x32xbf16>
    %142 = arith.truncf %139 : vector<16x64xf32> to vector<16x64xbf16>
    %cst_61 = arith.constant dense<0.000000e+00> : vector<16x32xf32>
    %143 = tpu.matmul %142, %141, %cst_61 {dimension_numbers = #tpu.dot_dimension_numbers<[1], [0], [0], [1], [0, 0, 1, 1], [], []>} : vector<16x64xbf16>, vector<64x32xbf16>, vector<16x32xf32> -> vector<16x32xf32>
    %c0_62 = arith.constant 0 : index
    %c0_63 = arith.constant 0 : index
    %c0_64 = arith.constant 0 : index
    %144 = vector.load %arg14[%c0_62, %c0_63, %c0_64] : memref<2x1x32xf32, #tpu.memory_space<vmem>>, vector<1x1x32xf32>
    %145 = vector.shape_cast %144 : vector<1x1x32xf32> to vector<1x32xf32>
    %146 = vector.broadcast %145 : vector<1x32xf32> to vector<16x32xf32>
    %147 = arith.addf %143, %146 : vector<16x32xf32>
    %148 = arith.addf %147, %123 : vector<16x32xf32>
    %c0_65 = arith.constant 0 : index
    %c0_66 = arith.constant 0 : index
    %c0_67 = arith.constant 0 : index
    %149 = vector.load %arg15[%c0_65, %c0_66, %c0_67] : memref<2x1x32xf32, #tpu.memory_space<vmem>>, vector<1x1x32xf32>
    %150 = vector.shape_cast %149 : vector<1x1x32xf32> to vector<1x32xf32>
    %c0_68 = arith.constant 0 : index
    %c0_69 = arith.constant 0 : index
    %c0_70 = arith.constant 0 : index
    %151 = vector.load %arg16[%c0_68, %c0_69, %c0_70] : memref<2x1x32xf32, #tpu.memory_space<vmem>>, vector<1x1x32xf32>
    %152 = vector.shape_cast %151 : vector<1x1x32xf32> to vector<1x32xf32>
    %cst_71 = arith.constant dense<0.000000e+00> : vector<16xf32>
    %153 = vector.multi_reduction <add>, %148, %cst_71 [1] : vector<16x32xf32> to vector<16xf32>
    %154 = vector.shape_cast %153 : vector<16xf32> to vector<16x1xf32>
    %cst_72 = arith.constant 3.200000e+01 : f32
    %155 = vector.broadcast %cst_72 : f32 to vector<16x1xf32>
    %156 = arith.divf %154, %155 : vector<16x1xf32>
    %157 = vector.broadcast %156 : vector<16x1xf32> to vector<16x32xf32>
    %158 = arith.subf %148, %157 : vector<16x32xf32>
    %159 = arith.mulf %158, %158 : vector<16x32xf32>
    %cst_73 = arith.constant dense<0.000000e+00> : vector<16xf32>
    %160 = vector.multi_reduction <add>, %159, %cst_73 [1] : vector<16x32xf32> to vector<16xf32>
    %161 = vector.shape_cast %160 : vector<16xf32> to vector<16x1xf32>
    %cst_74 = arith.constant 3.200000e+01 : f32
    %162 = vector.broadcast %cst_74 : f32 to vector<16x1xf32>
    %163 = arith.divf %161, %162 : vector<16x1xf32>
    %164 = vector.broadcast %156 : vector<16x1xf32> to vector<16x32xf32>
    %165 = arith.subf %148, %164 : vector<16x32xf32>
    %cst_75 = arith.constant 9.99999996E-13 : f32
    %166 = vector.broadcast %cst_75 : f32 to vector<16x1xf32>
    %167 = arith.addf %163, %166 : vector<16x1xf32>
    %168 = math.rsqrt %167 : vector<16x1xf32>
    %169 = vector.broadcast %168 : vector<16x1xf32> to vector<16x32xf32>
    %170 = arith.mulf %165, %169 : vector<16x32xf32>
    %171 = vector.broadcast %150 : vector<1x32xf32> to vector<16x32xf32>
    %172 = arith.mulf %170, %171 : vector<16x32xf32>
    %173 = vector.broadcast %152 : vector<1x32xf32> to vector<16x32xf32>
    %174 = arith.addf %172, %173 : vector<16x32xf32>
    %c1 = arith.constant 1 : index
    %c0_76 = arith.constant 0 : index
    %c0_77 = arith.constant 0 : index
    %175 = vector.load %arg5[%c1, %c0_76, %c0_77] : memref<2x32x96xbf16, #tpu.memory_space<vmem>>, vector<1x32x96xbf16>
    %176 = vector.shape_cast %175 : vector<1x32x96xbf16> to vector<32x96xbf16>
    %177 = arith.truncf %174 : vector<16x32xf32> to vector<16x32xbf16>
    %cst_78 = arith.constant dense<0.000000e+00> : vector<16x96xf32>
    %178 = tpu.matmul %177, %176, %cst_78 {dimension_numbers = #tpu.dot_dimension_numbers<[1], [0], [0], [1], [0, 0, 1, 1], [], []>} : vector<16x32xbf16>, vector<32x96xbf16>, vector<16x96xf32> -> vector<16x96xf32>
    %c1_79 = arith.constant 1 : index
    %c0_80 = arith.constant 0 : index
    %c0_81 = arith.constant 0 : index
    %179 = vector.load %arg6[%c1_79, %c0_80, %c0_81] : memref<2x1x96xf32, #tpu.memory_space<vmem>>, vector<1x1x96xf32>
    %180 = vector.shape_cast %179 : vector<1x1x96xf32> to vector<1x96xf32>
    %181 = vector.broadcast %180 : vector<1x96xf32> to vector<16x96xf32>
    %182 = arith.addf %178, %181 : vector<16x96xf32>
    %183 = vector.extract_strided_slice %182 {offsets = [0, 0], sizes = [16, 16], strides = [1, 1]} : vector<16x96xf32> to vector<16x16xf32>
    %184 = vector.shape_cast %183 : vector<16x16xf32> to vector<2x8x16xf32>
    %185 = vector.extract_strided_slice %182 {offsets = [0, 32], sizes = [16, 16], strides = [1, 1]} : vector<16x96xf32> to vector<16x16xf32>
    %186 = vector.shape_cast %185 : vector<16x16xf32> to vector<2x8x16xf32>
    %187 = vector.extract_strided_slice %182 {offsets = [0, 64], sizes = [16, 16], strides = [1, 1]} : vector<16x96xf32> to vector<16x16xf32>
    %188 = vector.shape_cast %187 : vector<16x16xf32> to vector<2x8x16xf32>
    %189 = arith.truncf %184 : vector<2x8x16xf32> to vector<2x8x16xbf16>
    %190 = arith.truncf %186 : vector<2x8x16xf32> to vector<2x8x16xbf16>
    "tpu.trace_start"() <{level = 10 : i32, message = "bqd,bkd->bqk"}> : () -> ()
    %cst_82 = arith.constant dense<0.000000e+00> : vector<2x8x8xf32>
    %191 = tpu.matmul %189, %190, %cst_82 {dimension_numbers = #tpu.dot_dimension_numbers<[2], [2], [1], [1], [0, 0, 0, 1, 1, 1], [0], [0]>} : vector<2x8x16xbf16>, vector<2x8x16xbf16>, vector<2x8x8xf32> -> vector<2x8x8xf32>
    "tpu.trace_stop"() : () -> ()
    %cst_83 = arith.constant 2.500000e-01 : f32
    %192 = vector.broadcast %cst_83 : f32 to vector<2x8x8xf32>
    %193 = arith.mulf %191, %192 : vector<2x8x8xf32>
    %194 = vector.broadcast %26 : vector<2x1x8xf32> to vector<2x8x8xf32>
    %195 = arith.addf %193, %194 : vector<2x8x8xf32>
    %cst_84 = arith.constant dense<0xFF800000> : vector<2x8xf32>
    %196 = vector.multi_reduction <maximumf>, %195, %cst_84 [2] : vector<2x8x8xf32> to vector<2x8xf32>
    %197 = vector.shape_cast %196 : vector<2x8xf32> to vector<2x8x1xf32>
    %198 = vector.broadcast %197 : vector<2x8x1xf32> to vector<2x8x8xf32>
    %199 = arith.subf %195, %198 : vector<2x8x8xf32>
    %200 = math.exp %199 : vector<2x8x8xf32>
    %cst_85 = arith.constant dense<0.000000e+00> : vector<2x8xf32>
    %201 = vector.multi_reduction <add>, %200, %cst_85 [2] : vector<2x8x8xf32> to vector<2x8xf32>
    %202 = vector.shape_cast %201 : vector<2x8xf32> to vector<2x8x1xf32>
    %203 = tpu.reciprocal %202 {approx = true} : vector<2x8x1xf32> -> vector<2x8x1xf32>
    %204 = vector.broadcast %203 : vector<2x8x1xf32> to vector<2x8x8xf32>
    %205 = arith.mulf %200, %204 : vector<2x8x8xf32>
    %206 = arith.truncf %205 : vector<2x8x8xf32> to vector<2x8x8xbf16>
    %207 = arith.truncf %188 : vector<2x8x16xf32> to vector<2x8x16xbf16>
    "tpu.trace_start"() <{level = 10 : i32, message = "bqk,bkd->bqd"}> : () -> ()
    %cst_86 = arith.constant dense<0.000000e+00> : vector<2x8x16xf32>
    %208 = tpu.matmul %206, %207, %cst_86 {dimension_numbers = #tpu.dot_dimension_numbers<[2], [1], [1], [2], [0, 0, 0, 1, 1, 2], [0], [0]>} : vector<2x8x8xbf16>, vector<2x8x16xbf16>, vector<2x8x16xf32> -> vector<2x8x16xf32>
    "tpu.trace_stop"() : () -> ()
    %209 = vector.extract_strided_slice %182 {offsets = [0, 16], sizes = [16, 16], strides = [1, 1]} : vector<16x96xf32> to vector<16x16xf32>
    %210 = vector.shape_cast %209 : vector<16x16xf32> to vector<2x8x16xf32>
    %211 = vector.extract_strided_slice %182 {offsets = [0, 48], sizes = [16, 16], strides = [1, 1]} : vector<16x96xf32> to vector<16x16xf32>
    %212 = vector.shape_cast %211 : vector<16x16xf32> to vector<2x8x16xf32>
    %213 = vector.extract_strided_slice %182 {offsets = [0, 80], sizes = [16, 16], strides = [1, 1]} : vector<16x96xf32> to vector<16x16xf32>
    %214 = vector.shape_cast %213 : vector<16x16xf32> to vector<2x8x16xf32>
    %215 = arith.truncf %210 : vector<2x8x16xf32> to vector<2x8x16xbf16>
    %216 = arith.truncf %212 : vector<2x8x16xf32> to vector<2x8x16xbf16>
    "tpu.trace_start"() <{level = 10 : i32, message = "bqd,bkd->bqk"}> : () -> ()
    %cst_87 = arith.constant dense<0.000000e+00> : vector<2x8x8xf32>
    %217 = tpu.matmul %215, %216, %cst_87 {dimension_numbers = #tpu.dot_dimension_numbers<[2], [2], [1], [1], [0, 0, 0, 1, 1, 1], [0], [0]>} : vector<2x8x16xbf16>, vector<2x8x16xbf16>, vector<2x8x8xf32> -> vector<2x8x8xf32>
    "tpu.trace_stop"() : () -> ()
    %cst_88 = arith.constant 2.500000e-01 : f32
    %218 = vector.broadcast %cst_88 : f32 to vector<2x8x8xf32>
    %219 = arith.mulf %217, %218 : vector<2x8x8xf32>
    %220 = vector.broadcast %26 : vector<2x1x8xf32> to vector<2x8x8xf32>
    %221 = arith.addf %219, %220 : vector<2x8x8xf32>
    %cst_89 = arith.constant dense<0xFF800000> : vector<2x8xf32>
    %222 = vector.multi_reduction <maximumf>, %221, %cst_89 [2] : vector<2x8x8xf32> to vector<2x8xf32>
    %223 = vector.shape_cast %222 : vector<2x8xf32> to vector<2x8x1xf32>
    %224 = vector.broadcast %223 : vector<2x8x1xf32> to vector<2x8x8xf32>
    %225 = arith.subf %221, %224 : vector<2x8x8xf32>
    %226 = math.exp %225 : vector<2x8x8xf32>
    %cst_90 = arith.constant dense<0.000000e+00> : vector<2x8xf32>
    %227 = vector.multi_reduction <add>, %226, %cst_90 [2] : vector<2x8x8xf32> to vector<2x8xf32>
    %228 = vector.shape_cast %227 : vector<2x8xf32> to vector<2x8x1xf32>
    %229 = tpu.reciprocal %228 {approx = true} : vector<2x8x1xf32> -> vector<2x8x1xf32>
    %230 = vector.broadcast %229 : vector<2x8x1xf32> to vector<2x8x8xf32>
    %231 = arith.mulf %226, %230 : vector<2x8x8xf32>
    %232 = arith.truncf %231 : vector<2x8x8xf32> to vector<2x8x8xbf16>
    %233 = arith.truncf %214 : vector<2x8x16xf32> to vector<2x8x16xbf16>
    "tpu.trace_start"() <{level = 10 : i32, message = "bqk,bkd->bqd"}> : () -> ()
    %cst_91 = arith.constant dense<0.000000e+00> : vector<2x8x16xf32>
    %234 = tpu.matmul %232, %233, %cst_91 {dimension_numbers = #tpu.dot_dimension_numbers<[2], [1], [1], [2], [0, 0, 0, 1, 1, 2], [0], [0]>} : vector<2x8x8xbf16>, vector<2x8x16xbf16>, vector<2x8x16xf32> -> vector<2x8x16xf32>
    "tpu.trace_stop"() : () -> ()
    %235 = tpu.concatenate %208, %234 in 2 : vector<2x8x16xf32>, vector<2x8x16xf32> -> vector<2x8x32xf32>
    %236 = vector.shape_cast %235 : vector<2x8x32xf32> to vector<16x32xf32>
    %c1_92 = arith.constant 1 : index
    %c0_93 = arith.constant 0 : index
    %c0_94 = arith.constant 0 : index
    %237 = vector.load %arg7[%c1_92, %c0_93, %c0_94] : memref<2x32x32xbf16, #tpu.memory_space<vmem>>, vector<1x32x32xbf16>
    %238 = vector.shape_cast %237 : vector<1x32x32xbf16> to vector<32x32xbf16>
    %239 = arith.truncf %236 : vector<16x32xf32> to vector<16x32xbf16>
    %cst_95 = arith.constant dense<0.000000e+00> : vector<16x32xf32>
    %240 = tpu.matmul %239, %238, %cst_95 {dimension_numbers = #tpu.dot_dimension_numbers<[1], [0], [0], [1], [0, 0, 1, 1], [], []>} : vector<16x32xbf16>, vector<32x32xbf16>, vector<16x32xf32> -> vector<16x32xf32>
    %c1_96 = arith.constant 1 : index
    %c0_97 = arith.constant 0 : index
    %c0_98 = arith.constant 0 : index
    %241 = vector.load %arg8[%c1_96, %c0_97, %c0_98] : memref<2x1x32xf32, #tpu.memory_space<vmem>>, vector<1x1x32xf32>
    %242 = vector.shape_cast %241 : vector<1x1x32xf32> to vector<1x32xf32>
    %243 = vector.broadcast %242 : vector<1x32xf32> to vector<16x32xf32>
    %244 = arith.addf %240, %243 : vector<16x32xf32>
    %245 = arith.addf %244, %174 : vector<16x32xf32>
    %c1_99 = arith.constant 1 : index
    %c0_100 = arith.constant 0 : index
    %c0_101 = arith.constant 0 : index
    %246 = vector.load %arg9[%c1_99, %c0_100, %c0_101] : memref<2x1x32xf32, #tpu.memory_space<vmem>>, vector<1x1x32xf32>
    %247 = vector.shape_cast %246 : vector<1x1x32xf32> to vector<1x32xf32>
    %c1_102 = arith.constant 1 : index
    %c0_103 = arith.constant 0 : index
    %c0_104 = arith.constant 0 : index
    %248 = vector.load %arg10[%c1_102, %c0_103, %c0_104] : memref<2x1x32xf32, #tpu.memory_space<vmem>>, vector<1x1x32xf32>
    %249 = vector.shape_cast %248 : vector<1x1x32xf32> to vector<1x32xf32>
    %cst_105 = arith.constant dense<0.000000e+00> : vector<16xf32>
    %250 = vector.multi_reduction <add>, %245, %cst_105 [1] : vector<16x32xf32> to vector<16xf32>
    %251 = vector.shape_cast %250 : vector<16xf32> to vector<16x1xf32>
    %cst_106 = arith.constant 3.200000e+01 : f32
    %252 = vector.broadcast %cst_106 : f32 to vector<16x1xf32>
    %253 = arith.divf %251, %252 : vector<16x1xf32>
    %254 = vector.broadcast %253 : vector<16x1xf32> to vector<16x32xf32>
    %255 = arith.subf %245, %254 : vector<16x32xf32>
    %256 = arith.mulf %255, %255 : vector<16x32xf32>
    %cst_107 = arith.constant dense<0.000000e+00> : vector<16xf32>
    %257 = vector.multi_reduction <add>, %256, %cst_107 [1] : vector<16x32xf32> to vector<16xf32>
    %258 = vector.shape_cast %257 : vector<16xf32> to vector<16x1xf32>
    %cst_108 = arith.constant 3.200000e+01 : f32
    %259 = vector.broadcast %cst_108 : f32 to vector<16x1xf32>
    %260 = arith.divf %258, %259 : vector<16x1xf32>
    %261 = vector.broadcast %253 : vector<16x1xf32> to vector<16x32xf32>
    %262 = arith.subf %245, %261 : vector<16x32xf32>
    %cst_109 = arith.constant 9.99999996E-13 : f32
    %263 = vector.broadcast %cst_109 : f32 to vector<16x1xf32>
    %264 = arith.addf %260, %263 : vector<16x1xf32>
    %265 = math.rsqrt %264 : vector<16x1xf32>
    %266 = vector.broadcast %265 : vector<16x1xf32> to vector<16x32xf32>
    %267 = arith.mulf %262, %266 : vector<16x32xf32>
    %268 = vector.broadcast %247 : vector<1x32xf32> to vector<16x32xf32>
    %269 = arith.mulf %267, %268 : vector<16x32xf32>
    %270 = vector.broadcast %249 : vector<1x32xf32> to vector<16x32xf32>
    %271 = arith.addf %269, %270 : vector<16x32xf32>
    %c1_110 = arith.constant 1 : index
    %c0_111 = arith.constant 0 : index
    %c0_112 = arith.constant 0 : index
    %272 = vector.load %arg11[%c1_110, %c0_111, %c0_112] : memref<2x32x64xbf16, #tpu.memory_space<vmem>>, vector<1x32x64xbf16>
    %273 = vector.shape_cast %272 : vector<1x32x64xbf16> to vector<32x64xbf16>
    %274 = arith.truncf %271 : vector<16x32xf32> to vector<16x32xbf16>
    %cst_113 = arith.constant dense<0.000000e+00> : vector<16x64xf32>
    %275 = tpu.matmul %274, %273, %cst_113 {dimension_numbers = #tpu.dot_dimension_numbers<[1], [0], [0], [1], [0, 0, 1, 1], [], []>} : vector<16x32xbf16>, vector<32x64xbf16>, vector<16x64xf32> -> vector<16x64xf32>
    %c1_114 = arith.constant 1 : index
    %c0_115 = arith.constant 0 : index
    %c0_116 = arith.constant 0 : index
    %276 = vector.load %arg12[%c1_114, %c0_115, %c0_116] : memref<2x1x64xf32, #tpu.memory_space<vmem>>, vector<1x1x64xf32>
    %277 = vector.shape_cast %276 : vector<1x1x64xf32> to vector<1x64xf32>
    %278 = vector.broadcast %277 : vector<1x64xf32> to vector<16x64xf32>
    %279 = arith.addf %275, %278 : vector<16x64xf32>
    %cst_117 = arith.constant 5.000000e-01 : f32
    %280 = vector.broadcast %cst_117 : f32 to vector<16x64xf32>
    %281 = arith.mulf %280, %279 : vector<16x64xf32>
    %cst_118 = arith.constant 0.707106769 : f32
    %282 = vector.broadcast %cst_118 : f32 to vector<16x64xf32>
    %283 = arith.mulf %279, %282 : vector<16x64xf32>
    %284 = math.erf %283 : vector<16x64xf32>
    %cst_119 = arith.constant 1.000000e+00 : f32
    %285 = vector.broadcast %cst_119 : f32 to vector<16x64xf32>
    %286 = arith.addf %285, %284 : vector<16x64xf32>
    %287 = arith.mulf %281, %286 : vector<16x64xf32>
    %c1_120 = arith.constant 1 : index
    %c0_121 = arith.constant 0 : index
    %c0_122 = arith.constant 0 : index
    %288 = vector.load %arg13[%c1_120, %c0_121, %c0_122] : memref<2x64x32xbf16, #tpu.memory_space<vmem>>, vector<1x64x32xbf16>
    %289 = vector.shape_cast %288 : vector<1x64x32xbf16> to vector<64x32xbf16>
    %290 = arith.truncf %287 : vector<16x64xf32> to vector<16x64xbf16>
    %cst_123 = arith.constant dense<0.000000e+00> : vector<16x32xf32>
    %291 = tpu.matmul %290, %289, %cst_123 {dimension_numbers = #tpu.dot_dimension_numbers<[1], [0], [0], [1], [0, 0, 1, 1], [], []>} : vector<16x64xbf16>, vector<64x32xbf16>, vector<16x32xf32> -> vector<16x32xf32>
    %c1_124 = arith.constant 1 : index
    %c0_125 = arith.constant 0 : index
    %c0_126 = arith.constant 0 : index
    %292 = vector.load %arg14[%c1_124, %c0_125, %c0_126] : memref<2x1x32xf32, #tpu.memory_space<vmem>>, vector<1x1x32xf32>
    %293 = vector.shape_cast %292 : vector<1x1x32xf32> to vector<1x32xf32>
    %294 = vector.broadcast %293 : vector<1x32xf32> to vector<16x32xf32>
    %295 = arith.addf %291, %294 : vector<16x32xf32>
    %296 = arith.addf %295, %271 : vector<16x32xf32>
    %c1_127 = arith.constant 1 : index
    %c0_128 = arith.constant 0 : index
    %c0_129 = arith.constant 0 : index
    %297 = vector.load %arg15[%c1_127, %c0_128, %c0_129] : memref<2x1x32xf32, #tpu.memory_space<vmem>>, vector<1x1x32xf32>
    %298 = vector.shape_cast %297 : vector<1x1x32xf32> to vector<1x32xf32>
    %c1_130 = arith.constant 1 : index
    %c0_131 = arith.constant 0 : index
    %c0_132 = arith.constant 0 : index
    %299 = vector.load %arg16[%c1_130, %c0_131, %c0_132] : memref<2x1x32xf32, #tpu.memory_space<vmem>>, vector<1x1x32xf32>
    %300 = vector.shape_cast %299 : vector<1x1x32xf32> to vector<1x32xf32>
    %cst_133 = arith.constant dense<0.000000e+00> : vector<16xf32>
    %301 = vector.multi_reduction <add>, %296, %cst_133 [1] : vector<16x32xf32> to vector<16xf32>
    %302 = vector.shape_cast %301 : vector<16xf32> to vector<16x1xf32>
    %cst_134 = arith.constant 3.200000e+01 : f32
    %303 = vector.broadcast %cst_134 : f32 to vector<16x1xf32>
    %304 = arith.divf %302, %303 : vector<16x1xf32>
    %305 = vector.broadcast %304 : vector<16x1xf32> to vector<16x32xf32>
    %306 = arith.subf %296, %305 : vector<16x32xf32>
    %307 = arith.mulf %306, %306 : vector<16x32xf32>
    %cst_135 = arith.constant dense<0.000000e+00> : vector<16xf32>
    %308 = vector.multi_reduction <add>, %307, %cst_135 [1] : vector<16x32xf32> to vector<16xf32>
    %309 = vector.shape_cast %308 : vector<16xf32> to vector<16x1xf32>
    %cst_136 = arith.constant 3.200000e+01 : f32
    %310 = vector.broadcast %cst_136 : f32 to vector<16x1xf32>
    %311 = arith.divf %309, %310 : vector<16x1xf32>
    %312 = vector.broadcast %304 : vector<16x1xf32> to vector<16x32xf32>
    %313 = arith.subf %296, %312 : vector<16x32xf32>
    %cst_137 = arith.constant 9.99999996E-13 : f32
    %314 = vector.broadcast %cst_137 : f32 to vector<16x1xf32>
    %315 = arith.addf %311, %314 : vector<16x1xf32>
    %316 = math.rsqrt %315 : vector<16x1xf32>
    %317 = vector.broadcast %316 : vector<16x1xf32> to vector<16x32xf32>
    %318 = arith.mulf %313, %317 : vector<16x32xf32>
    %319 = vector.broadcast %298 : vector<1x32xf32> to vector<16x32xf32>
    %320 = arith.mulf %318, %319 : vector<16x32xf32>
    %321 = vector.broadcast %300 : vector<1x32xf32> to vector<16x32xf32>
    %322 = arith.addf %320, %321 : vector<16x32xf32>
    %323 = vector.shape_cast %322 : vector<16x32xf32> to vector<2x8x32xf32>
    %324 = vector.extract_strided_slice %323 {offsets = [0, 0, 0], sizes = [2, 1, 32], strides = [1, 1, 1]} : vector<2x8x32xf32> to vector<2x1x32xf32>
    %325 = vector.shape_cast %324 : vector<2x1x32xf32> to vector<2x32xf32>
    %c0_138 = arith.constant 0 : index
    %c0_139 = arith.constant 0 : index
    %326 = vector.load %arg17[%c0_138, %c0_139] : memref<32x32xbf16, #tpu.memory_space<vmem>>, vector<32x32xbf16>
    %327 = arith.truncf %325 : vector<2x32xf32> to vector<2x32xbf16>
    %cst_140 = arith.constant dense<0.000000e+00> : vector<2x32xf32>
    %328 = tpu.matmul %327, %326, %cst_140 {dimension_numbers = #tpu.dot_dimension_numbers<[1], [0], [0], [1], [0, 0, 1, 1], [], []>} : vector<2x32xbf16>, vector<32x32xbf16>, vector<2x32xf32> -> vector<2x32xf32>
    %c0_141 = arith.constant 0 : index
    %c0_142 = arith.constant 0 : index
    %329 = vector.load %arg18[%c0_141, %c0_142] : memref<1x32xf32, #tpu.memory_space<vmem>>, vector<1x32xf32>
    %330 = vector.broadcast %329 : vector<1x32xf32> to vector<2x32xf32>
    %331 = arith.addf %328, %330 : vector<2x32xf32>
    %332 = math.tanh %331 : vector<2x32xf32>
    %c0_143 = arith.constant 0 : index
    %c0_144 = arith.constant 0 : index
    %333 = vector.load %arg19[%c0_143, %c0_144] : memref<32x128xbf16, #tpu.memory_space<vmem>>, vector<32x128xbf16>
    %334 = arith.truncf %332 : vector<2x32xf32> to vector<2x32xbf16>
    %cst_145 = arith.constant dense<0.000000e+00> : vector<2x128xf32>
    %335 = tpu.matmul %334, %333, %cst_145 {dimension_numbers = #tpu.dot_dimension_numbers<[1], [0], [0], [1], [0, 0, 1, 1], [], []>} : vector<2x32xbf16>, vector<32x128xbf16>, vector<2x128xf32> -> vector<2x128xf32>
    %c0_146 = arith.constant 0 : index
    %c0_147 = arith.constant 0 : index
    %336 = vector.load %arg20[%c0_146, %c0_147] : memref<1x128xf32, #tpu.memory_space<vmem>>, vector<1x128xf32>
    %337 = vector.broadcast %336 : vector<1x128xf32> to vector<2x128xf32>
    %338 = arith.addf %335, %337 : vector<2x128xf32>
    %c0_148 = arith.constant 0 : index
    %c0_149 = arith.constant 0 : index
    %339 = vector.load %arg21[%c0_148, %c0_149] : memref<2x128xf32, #tpu.memory_space<vmem>>, vector<2x128xf32>
    tpu.vector_store %arg21[%c0_148, %c0_149], %338 {strides = array<i32>} : memref<2x128xf32, #tpu.memory_space<vmem>>, vector<2x128xf32>,
    return
  }
  func.func @transform_0(%arg0: i32) -> (i32, i32, i32) {
    %c0_i32 = arith.constant 0 : i32
    %c0_i32_0 = arith.constant 0 : i32
    %c0_i32_1 = arith.constant 0 : i32
    %c0_i32_2 = arith.constant 0 : i32
    return %c0_i32, %c0_i32_0, %c0_i32_1 : i32, i32, i32
  }
  func.func @transform_1(%arg0: i32) -> (i32, i32, i32) {
    %c0_i32 = arith.constant 0 : i32
    %c0_i32_0 = arith.constant 0 : i32
    %c0_i32_1 = arith.constant 0 : i32
    %c0_i32_2 = arith.constant 0 : i32
    return %c0_i32, %c0_i32_0, %c0_i32_1 : i32, i32, i32
  }
  func.func @transform_2(%arg0: i32) -> (i32, i32) {
    %c0_i32 = arith.constant 0 : i32
    %c0_i32_0 = arith.constant 0 : i32
    %c0_i32_1 = arith.constant 0 : i32
    return %c0_i32, %c0_i32_0 : i32, i32
  }
  func.func @transform_3(%arg0: i32) -> (i32, i32) {
    %c0_i32 = arith.constant 0 : i32
    %c0_i32_0 = arith.constant 0 : i32
    %c0_i32_1 = arith.constant 0 : i32
    return %c0_i32, %c0_i32_0 : i32, i32
  }
  func.func @transform_4(%arg0: i32) -> (i32, i32, i32) {
    %c0_i32 = arith.constant 0 : i32
    %c0_i32_0 = arith.constant 0 : i32
    %c0_i32_1 = arith.constant 0 : i32
    %c0_i32_2 = arith.constant 0 : i32
    return %c0_i32, %c0_i32_0, %c0_i32_1 : i32, i32, i32
  }
  func.func @transform_5(%arg0: i32) -> (i32, i32, i32) {
    %c0_i32 = arith.constant 0 : i32
    %c0_i32_0 = arith.constant 0 : i32
    %c0_i32_1 = arith.constant 0 : i32
    %c0_i32_2 = arith.constant 0 : i32
    return %c0_i32, %c0_i32_0, %c0_i32_1 : i32, i32, i32
  }
  func.func @transform_6(%arg0: i32) -> (i32, i32, i32) {
    %c0_i32 = arith.constant 0 : i32
    %c0_i32_0 = arith.constant 0 : i32
    %c0_i32_1 = arith.constant 0 : i32
    %c0_i32_2 = arith.constant 0 : i32
    return %c0_i32, %c0_i32_0, %c0_i32_1 : i32, i32, i32
  }
  func.func @transform_7(%arg0: i32) -> (i32, i32, i32) {
    %c0_i32 = arith.constant 0 : i32
    %c0_i32_0 = arith.constant 0 : i32
    %c0_i32_1 = arith.constant 0 : i32
    %c0_i32_2 = arith.constant 0 : i32
    return %c0_i32, %c0_i32_0, %c0_i32_1 : i32, i32, i32
  }
  func.func @transform_8(%arg0: i32) -> (i32, i32, i32) {
    %c0_i32 = arith.constant 0 : i32
    %c0_i32_0 = arith.constant 0 : i32
    %c0_i32_1 = arith.constant 0 : i32
    %c0_i32_2 = arith.constant 0 : i32
    return %c0_i32, %c0_i32_0, %c0_i32_1 : i32, i32, i32
  }
  func.func @transform_9(%arg0: i32) -> (i32, i32, i32) {
    %c0_i32 = arith.constant 0 : i32
    %c0_i32_0 = arith.constant 0 : i32
    %c0_i32_1 = arith.constant 0 : i32
    %c0_i32_2 = arith.constant 0 : i32
    return %c0_i32, %c0_i32_0, %c0_i32_1 : i32, i32, i32
  }
  func.func @transform_10(%arg0: i32) -> (i32, i32, i32) {
    %c0_i32 = arith.constant 0 : i32
    %c0_i32_0 = arith.constant 0 : i32
    %c0_i32_1 = arith.constant 0 : i32
    %c0_i32_2 = arith.constant 0 : i32
    return %c0_i32, %c0_i32_0, %c0_i32_1 : i32, i32, i32
  }
  func.func @transform_11(%arg0: i32) -> (i32, i32, i32) {
    %c0_i32 = arith.constant 0 : i32
    %c0_i32_0 = arith.constant 0 : i32
    %c0_i32_1 = arith.constant 0 : i32
    %c0_i32_2 = arith.constant 0 : i32
    return %c0_i32, %c0_i32_0, %c0_i32_1 : i32, i32, i32
  }
  func.func @transform_12(%arg0: i32) -> (i32, i32, i32) {
    %c0_i32 = arith.constant 0 : i32
    %c0_i32_0 = arith.constant 0 : i32
    %c0_i32_1 = arith.constant 0 : i32
    %c0_i32_2 = arith.constant 0 : i32
    return %c0_i32, %c0_i32_0, %c0_i32_1 : i32, i32, i32
  }
  func.func @transform_13(%arg0: i32) -> (i32, i32, i32) {
    %c0_i32 = arith.constant 0 : i32
    %c0_i32_0 = arith.constant 0 : i32
    %c0_i32_1 = arith.constant 0 : i32
    %c0_i32_2 = arith.constant 0 : i32
    return %c0_i32, %c0_i32_0, %c0_i32_1 : i32, i32, i32
  }
  func.func @transform_14(%arg0: i32) -> (i32, i32, i32) {
    %c0_i32 = arith.constant 0 : i32
    %c0_i32_0 = arith.constant 0 : i32
    %c0_i32_1 = arith.constant 0 : i32
    %c0_i32_2 = arith.constant 0 : i32
    return %c0_i32, %c0_i32_0, %c0_i32_1 : i32, i32, i32
  }
  func.func @transform_15(%arg0: i32) -> (i32, i32, i32) {
    %c0_i32 = arith.constant 0 : i32
    %c0_i32_0 = arith.constant 0 : i32
    %c0_i32_1 = arith.constant 0 : i32
    %c0_i32_2 = arith.constant 0 : i32
    return %c0_i32, %c0_i32_0, %c0_i32_1 : i32, i32, i32
  }
  func.func @transform_16(%arg0: i32) -> (i32, i32) {
    %c0_i32 = arith.constant 0 : i32
    %c0_i32_0 = arith.constant 0 : i32
    %c0_i32_1 = arith.constant 0 : i32
    return %c0_i32, %c0_i32_0 : i32, i32
  }
  func.func @transform_17(%arg0: i32) -> (i32, i32) {
    %c0_i32 = arith.constant 0 : i32
    %c0_i32_0 = arith.constant 0 : i32
    %c0_i32_1 = arith.constant 0 : i32
    return %c0_i32, %c0_i32_0 : i32, i32
  }
  func.func @transform_18(%arg0: i32) -> (i32, i32) {
    %c0_i32 = arith.constant 0 : i32
    %c0_i32_0 = arith.constant 0 : i32
    %c0_i32_1 = arith.constant 0 : i32
    return %c0_i32, %c0_i32_0 : i32, i32
  }
  func.func @transform_19(%arg0: i32) -> (i32, i32) {
    %c0_i32 = arith.constant 0 : i32
    %c0_i32_0 = arith.constant 0 : i32
    %c0_i32_1 = arith.constant 0 : i32
    return %c0_i32, %c0_i32_0 : i32, i32
  }
  func.func @transform_20(%arg0: i32) -> (i32, i32) {
    %c0_i32 = arith.constant 0 : i32
    %c0_i32_0 = arith.constant 0 : i32
    %c0_i32_1 = arith.constant 0 : i32
    return %c0_i32, %c0_i32_0 : i32, i32
  }
}

</mosaic_0001>

<bundles_post_ra>
// kernel: bert_multilabel_forward.1
= control target key start
LH: loop header
LB: loop body
LE: loop exit
PB: predicated region body
PF: predicated region fallthrough
CT: control target
= control target key end

     0   :  { %s3017_s0 = inlined_call_operand.vmem [shape: f32[2,8,32], index: 0, kind: input, shape index: {}]   ;;  %s3018_s1 = inlined_call_operand.vmem [shape: f32[2,1,8], index: 1, kind: input, shape index: {}]   ;;  %s3019_s2 = inlined_call_operand.vmem [shape: f32[1,32], index: 2, kind: input, shape index: {}]   ;;  %s3020_s3 = inlined_call_operand.vmem [shape: f32[1,32], index: 3, kind: input, shape index: {}]   ;;  %s3021_s4 = inlined_call_operand.vmem [shape: bf16[2,32,96], index: 4, kind: input, shape index: {}]   ;;  %s3022_s5 = inlined_call_operand.vmem [shape: f32[2,1,96], index: 5, kind: input, shape index: {}]   ;;  %s3023_s6 = inlined_call_operand.vmem [shape: bf16[2,32,32], index: 6, kind: input, shape index: {}]   ;;  %s3024_s7 = inlined_call_operand.vmem [shape: f32[2,1,32], index: 7, kind: input, shape index: {}]   ;;  %s3025_s8 = inlined_call_operand.vmem [shape: f32[2,1,32], index: 8, kind: input, shape index: {}]   ;;  %s3026_s9 = inlined_call_operand.vmem [shape: f32[2,1,32], index: 9, kind: input, shape index: {}]   ;;  %s3027_s10 = inlined_call_operand.vmem [shape: bf16[2,32,64], index: 10, kind: input, shape index: {}]   ;;  %s3028_s11 = inlined_call_operand.vmem [shape: f32[2,1,64], index: 11, kind: input, shape index: {}]   ;;  %s3029_s12 = inlined_call_operand.vmem [shape: bf16[2,64,32], index: 12, kind: input, shape index: {}]   ;;  %s3030_s13 = inlined_call_operand.vmem [shape: f32[2,1,32], index: 13, kind: input, shape index: {}]   ;;  %s3031_s14 = inlined_call_operand.vmem [shape: f32[2,1,32], index: 14, kind: input, shape index: {}]   ;;  %s3032_s15 = inlined_call_operand.vmem [shape: f32[2,1,32], index: 15, kind: input, shape index: {}]   ;;  %s3033_s16 = inlined_call_operand.vmem [shape: bf16[32,32], index: 16, kind: input, shape index: {}]   ;;  %s3034_s17 = inlined_call_operand.vmem [shape: f32[1,32], index: 17, kind: input, shape index: {}]   ;;  %s3035_s18 = inlined_call_operand.vmem [shape: bf16[32,128], index: 18, kind: input, shape index: {}]   ;;  %s3036_s19 = inlined_call_operand.vmem [shape: f32[1,128], index: 19, kind: input, shape index: {}]   ;;  %s3037_s20 = inlined_call_operand.hbm [shape: f32[2,128], index: 20, kind: output, shape index: {}]  }
   0x1   :  { %3041 = sst [smem:[#allocation5_spill]] %s3017_s0 }
   0x2   :  { %3042 = sst [smem:[#allocation6_spill]] %s3018_s1 }
   0x3   :  { %3043 = sst [smem:[#allocation7_spill]] %s3019_s2 }
   0x4   :  { %3044 = sst [smem:[#allocation8_spill]] %s3020_s3 }
   0x5   :  { %3045 = sst [smem:[#allocation9_spill]] %s3021_s4 }
   0x6   :  { %s3046_s23 = sld [smem:[#allocation5_spill]]  ;;  %vm71_vm0 = vcmask 261120  }
   0xc   :  { %v67_v0 = vld [vmem:[%s3046_s23] sm:$0xff]  ;;  %v68_v1 = vld [vmem:[%s3046_s23 + $0x8] sm:$0xff] }
   0xd   :  { %v72_v2 = vsel %vm71_vm0, %v67_v0, 0.0  ;;  %v75_v3 = vsel %vm71_vm0, %v68_v1, 0.0 }
   0xe   :  { %73 = vadd.xlane.f32.xlu0 %v72_v2 }
  0x12   :  { %76 = vadd.xlane.f32.xlu0 %v75_v3 }
  0x13   :  { %25 = vsyncpa [#allocation3], 0  ;;  %s3047_s26 = sld [smem:[#allocation9_spill]]  ;;  %v2479_v15 = vmov 0.0   ;;  %vm2480_vm1 = vmmov 0   ;;  %s3048_s30 = sld [smem:[#allocation7_spill]] }
  0x14   :  { %2166 = vmatprep.subr.bf16.mxu0 %v2479_v15  ;;  %2174 = vmatprep.subr.bf16.mxu1 %v2479_v15  ;;  %s3049_s1 = sld [smem:[#allocation8_spill]]  ;;  %v2002_v34 = vld [vmem:[%s3022_s5] ss:$0 sm:$0xff]  ;;  %s2481_s24 = smov 96   ;;  %vm190_vm2 = vcmask 130048   ;;  %vm302_vm3 = vcmask 64512  }
  0x15   :  { %2170 = vmatprep.mubr.msk.bf16.mxu0 %vm2480_vm1, %v2479_v15  ;;  %2176 = vmatprep.mubr.msk.bf16.mxu1 %vm2480_vm1, %v2479_v15  ;;  %s3050_s3 = sld [smem:[#allocation6_spill]]  ;;  %s2482_s4 = smov 64   ;;  %vm332_vm4 = vcmask 1043456   ;;  %vm890_vm5 = vcmask 523264   ;;  %vm1859_vm6 = vcmask 1041409  }
  0x16   :  { %s2483_s29 = smov 80   ;;  %s2485_s0 = smov 48  }
  0x17   :  { %s2486_s2 = smov 16  }
  0x19   :  { %v2369_v14 = vld [vmem:[%s3047_s26] sm:$0xff]   ;;  %v2370_v16 = vld [vmem:[%s3047_s26 + $0x8] sm:$0xff]  }
  0x1a   :  { %2167 = vmatpush3.bf16.msra.mxu0 %v2369_v14  ;;  %v2000_v25 = vld [vmem:[%s3048_s30] ss:$0 sm:$0xff]  ;;  %s2484_s30 = smov 112  }
  0x1b   :  { %2168 = vmatprep.subr.bf16.mxu0 %v2479_v15  ;;  %v2001_v29 = vld [vmem:[%s3049_s1] ss:$0 sm:$0xff]  ;;  %v2663_v53 = vld [vmem:[%s3050_s3 + $0x1] ss:$0 sm:$0xff] }
  0x1c   :  { %v2658_v48 = vld [vmem:[%s3050_s3] ss:$0 sm:$0xff] }
  0x1e   :  { %2169 = vmatpush3.bf16.msra.mxu0 %v2370_v16 }
  0x1f   :  { %2180 = vmatprep.subr.bf16.mxu0 %v2479_v15 }
  0x9b   :  { %v74_v4 = vpop.xlane.xlu0 %73 }
  0x9c   :  { %v79_v5 = vmul.f32 0.03125, %v74_v4 }
  0x9e   :  { %v81_v6 = vsub.f32 %v67_v0, %v79_v5 }
  0x9f   :  { %v77_v7 = vpop.xlane.xlu0 %76 }
  0xa0   :  { %v80_v8 = vmul.f32 0.03125, %v77_v7  ;;  %v83_v9 = vmul.f32 %v81_v6, %v81_v6 }
  0xa2   :  { %v82_v10 = vsub.f32 %v68_v1, %v80_v8  ;;  %v85_v11 = vsel %vm71_vm0, %v83_v9, 0.0 }
  0xa3   :  { %86 = vadd.xlane.f32.xlu1 %v85_v11 }
  0xa4   :  { %v84_v12 = vmul.f32 %v82_v10, %v82_v10 }
  0xa6   :  { %v88_v13 = vsel %vm71_vm0, %v84_v12, 0.0 }
  0xa7   :  { %89 = vadd.xlane.f32.xlu1 %v88_v13 }
 0x130   :  { %v87_v17 = vpop.xlane.xlu1 %86 }
 0x131   :  { %v91_v18 = vmul.f32 0.03125, %v87_v17 }
 0x133   :  { %v93_v19 = vadd.f32 1e-12, %v91_v18 }
 0x134   :  { %v90_v20 = vpop.xlane.xlu1 %89 }
 0x135   :  { %2393 = vrsqrt.f32 %v93_v19  ;;  %v92_v21 = vmul.f32 0.03125, %v90_v20 }
 0x137   :  { %v94_v22 = vadd.f32 1e-12, %v92_v21 }
 0x139   :  { %2395 = vrsqrt.f32 %v94_v22 }
 0x13f   :  { %v2394_v23 = vpop.eup %2393 }
 0x140   :  { %v97_v24 = vmul.f32 %v2394_v23, %v81_v6 }
 0x142   :  { %v105_v28 = vmul.f32 %v2000_v25, %v97_v24 }
 0x143   :  { %v2396_v26 = vpop.eup %2395 }
 0x144   :  { %v98_v27 = vmul.f32 %v2396_v26, %v82_v10  ;;  %v2623_v31 = vadd.f32 %v2001_v29, %v105_v28 }
 0x146   :  { %v106_v30 = vmul.f32 %v2000_v25, %v98_v27 }
 0x148   :  { %v2625_v32 = vadd.f32 %v2001_v29, %v106_v30 }
 0x14a   :  { %v121_v33 = vpack.c.bf16 %v2625_v32, %v2623_v31 }
 0x14c   :  { %2171 = vmatmul.mubr.msk.bf16.vlgmr.msra.gmra.mrb[0].mxu0 %vm71_vm0, %v121_v33 }
 0x14d   :  { %2182 = vmatprep.mubr.msk.bf16.mxu0 %vm2480_vm1, %v2479_v15 }
 0x21f   :  { %v178_v35 = vpop.f32.mrb[0].mxu0 }
 0x220   :  { %v179_v36 = vadd.f32 %v2002_v34, %v178_v35  ;;  %v2172_v37 = vpop.f32.mrb[1].mxu0 }
 0x221   :  { %v181_v38 = vpop.f32.mrb[2].mxu0 }
 0x222   :  { %v2635_v39 = vpack.c.bf16 %v179_v36, %v179_v36  ;;  %v182_v40 = vadd.f32 %v2002_v34, %v181_v38  ;;  %v2173_v41 = vpop.f32.mrb[3].mxu0 }
 0x224   :  { %v2637_v42 = vpack.c.bf16 %v182_v40, %v182_v40  ;;  %188 = vrot.lane.b32.xlu0 %v2635_v39, %s2481_s24 }
 0x226   :  { %238 = vrot.lane.b32.xlu1 %v2637_v42, %s2481_s24 }
 0x296   :  { %v189_v43 = vpop.permute.xlu0 %188 }
 0x297   :  { %v195_v44 = vsel %vm190_vm2, %v189_v43, 0 }
 0x298   :  { %2175 = vmatpush3.bf16.xpose.msra.mxu1 %v195_v44  ;;  %v239_v45 = vpop.permute.xlu1 %238 }
 0x299   :  { %v244_v46 = vsel %vm190_vm2, %v239_v45, 0  ;;  %2186 = vmatprep.subr.bf16.mxu1 %v2479_v15 }
 0x29a   :  { %2181 = vmatpush3.bf16.xpose.msra.mxu0 %v244_v46 }
 0x29b   :  { %2192 = vmatprep.subr.bf16.mxu0 %v2479_v15 }
 0x29f   :  { %2177 = vmatmul.mubr.msk.bf16.vlgmr.msra.gmra.mrb[0].mxu1 %vm190_vm2, %v2635_v39 }
 0x2a0   :  { %2188 = vmatprep.mubr.msk.bf16.mxu1 %vm2480_vm1, %v2479_v15 }
 0x2a1   :  { %2183 = vmatmul.mubr.msk.bf16.vlgmr.msra.gmra.mrb[4].mxu0 %vm190_vm2, %v2637_v42 }
 0x2a2   :  { %2194 = vmatprep.mubr.msk.bf16.mxu0 %vm2480_vm1, %v2479_v15 }
 0x372   :  { %v231_v47 = vpop.f32.mrb[0].mxu1 }
 0x373   :  { %v286_v49 = vmul.f32 0.25, %v231_v47  ;;  %v2178_v50 = vpop.f32.mrb[1].mxu1 }
 0x374   :  { %v234_v51 = vpop.f32.mrb[2].mxu1  ;;  %v280_v52 = vpop.f32.mrb[4].mxu0 }
 0x375   :  { %v287_v54 = vmul.f32 0.25, %v280_v52  ;;  %v2179_v55 = vpop.f32.mrb[3].mxu1  ;;  %v2184_v56 = vpop.f32.mrb[5].mxu0  ;;  %v300_v57 = vadd.f32 %v2658_v48, %v286_v49 }
 0x376   :  { %v283_v58 = vpop.f32.mrb[6].mxu0 }
 0x377   :  { %v2185_v59 = vpop.f32.mrb[7].mxu0  ;;  %v303_v60 = vsel %vm302_vm3, %v300_v57, -inf  ;;  %v301_v61 = vadd.f32 %v2663_v53, %v287_v54 }
 0x378   :  { %304 = vmax.xlane.f32.xlu1 %v303_v60 }
 0x379   :  { %v306_v62 = vsel %vm302_vm3, %v301_v61, -inf }
 0x37a   :  { %307 = vmax.xlane.f32.xlu0 %v306_v62 }
 0x389   :  { %376 = vrot.lane.b32.xlu1 %v2637_v42, %s2482_s4 }
 0x38d   :  { %426 = vrot.lane.b32.xlu1 %v2635_v39, %s2483_s29 }
 0x405   :  { %v305_v63 = vpop.xlane.xlu1 %304 }
 0x406   :  { %v309_v0 = vsub.f32 %v300_v57, %v305_v63 }
 0x407   :  { %v308_v1 = vpop.xlane.xlu0 %307 }
 0x408   :  { %v311_v2 = vmul.f32 1.442695, %v309_v0  ;;  %v310_v3 = vsub.f32 %v301_v61, %v308_v1 }
 0x409   :  { %v377_v4 = vpop.permute.xlu1 %376 }
 0x40a   :  { %2397 = vpow2.f32 %v311_v2  ;;  %v313_v5 = vmul.f32 1.442695, %v310_v3  ;;  %v382_v6 = vsel %vm332_vm4, %v377_v4, 0 }
 0x40b   :  { %2193 = vmatpush3.bf16.msra.mxu0 %v382_v6 }
 0x40c   :  { %2399 = vpow2.f32 %v313_v5  ;;  %2204 = vmatprep.subr.bf16.mxu0 %v2479_v15 }
 0x40d   :  { %v427_v11 = vpop.permute.xlu1 %426 }
 0x40e   :  { %v432_v23 = vsel %vm190_vm2, %v427_v11, 0 }
 0x414   :  { %v2398_v7 = vpop.eup %2397 }
 0x415   :  { %v315_v8 = vsel %vm302_vm3, %v2398_v7, 0.0 }
 0x416   :  { %v2400_v9 = vpop.eup %2399  ;;  %316 = vadd.xlane.f32.xlu0 %v315_v8 }
 0x417   :  { %v318_v10 = vsel %vm302_vm3, %v2400_v9, 0.0 }
 0x418   :  { %319 = vadd.xlane.f32.xlu1 %v318_v10 }
 0x429   :  { %476 = vrot.lane.b32.xlu1 %v2637_v42, %s2483_s29 }
 0x42c   :  { %327 = vrot.lane.b32.xlu0 %v2635_v39, %s2482_s4 }
 0x42d   :  { %474 = vrot.lane.b32.xlu1 %v2637_v42, %s2484_s30 }
 0x430   :  { %424 = vrot.lane.b32.xlu0 %v2635_v39, %s2484_s30 }
 0x4a3   :  { %v317_v12 = vpop.xlane.xlu0 %316 }
 0x4a4   :  { %2401 = vrcp.f32 %v317_v12  ;;  %v2371_v12 = vld [vmem:[%s3023_s6] sm:$0xff]  }
 0x4a5   :  { %v320_v13 = vpop.xlane.xlu1 %319 }
 0x4a6   :  { %2403 = vrcp.f32 %v320_v13  ;;  %v2372_v13 = vld [vmem:[%s3023_s6 + $0x8] sm:$0xff]  }
 0x4a7   :  { %v328_v14 = vpop.permute.xlu0 %327 }
 0x4a8   :  { %v334_v16 = vsel %vm332_vm4, %v328_v14, 0 }
 0x4a9   :  { %2187 = vmatpush3.bf16.msra.mxu1 %v334_v16  ;;  %v477_v22 = vpop.permute.xlu1 %476 }
 0x4aa   :  { %2198 = vmatprep.subr.bf16.mxu1 %v2479_v15  ;;  %v482_v25 = vsel %vm190_vm2, %v477_v22, 0 }
 0x4ab   :  { %v425_v26 = vpop.permute.xlu0 %424 }
 0x4ad   :  { %v475_v27 = vpop.permute.xlu1 %474 }
 0x4ae   :  { %v2402_v17 = vpop.eup %2401 }
 0x4af   :  { %v323_v18 = vmul.f32 %v2402_v17, %v2398_v7 }
 0x4b0   :  { %v2404_v19 = vpop.eup %2403 }
 0x4b1   :  { %v324_v20 = vmul.f32 %v2404_v19, %v2400_v9  ;;  %v325_v21 = vpack.c.bf16 %v323_v18, %v323_v18 }
 0x4b3   :  { %2189 = vmatmul.mubr.msk.bf16.vlgmr.msra.gmra.mrb[4].mxu1 %vm302_vm3, %v325_v21  ;;  %v326_v24 = vpack.c.bf16 %v324_v20, %v324_v20 }
 0x4b4   :  { %2199 = vmatpush3.bf16.xpose.msra.mxu1 %v432_v23  ;;  %2200 = vmatprep.mubr.msk.bf16.mxu1 %vm2480_vm1, %v2479_v15 }
 0x4b5   :  { %2195 = vmatmul.mubr.msk.bf16.vlgmr.msra.gmra.mrb[8].mxu0 %vm302_vm3, %v326_v24  ;;  %2210 = vmatprep.subr.bf16.mxu1 %v2479_v15 }
 0x4b6   :  { %2205 = vmatpush3.bf16.xpose.msra.mxu0 %v482_v25  ;;  %2206 = vmatprep.mubr.msk.bf16.mxu0 %vm2480_vm1, %v2479_v15 }
 0x4b7   :  { %2216 = vmatprep.subr.bf16.mxu0 %v2479_v15 }
 0x4bb   :  { %2201 = vmatmul.mubr.msk.bf16.vlgmr.msra.gmra.mrb[8].mxu1 %vm190_vm2, %v425_v26 }
 0x4bc   :  { %2212 = vmatprep.mubr.msk.bf16.mxu1 %vm2480_vm1, %v2479_v15 }
 0x4bd   :  { %2207 = vmatmul.mubr.msk.bf16.vlgmr.msra.gmra.mrb[12].mxu0 %vm190_vm2, %v475_v27 }
 0x4be   :  { %2218 = vmatprep.mubr.msk.bf16.mxu0 %vm2480_vm1, %v2479_v15 }
 0x586   :  { %v2703_v28 = vpop.f32.mrb[4].mxu1 }
 0x587   :  { %v2190_v29 = vpop.f32.mrb[5].mxu1 }
 0x588   :  { %v373_v30 = vpop.f32.mrb[6].mxu1  ;;  %v2705_v33 = vpop.f32.mrb[8].mxu0 }
 0x589   :  { %v2191_v34 = vpop.f32.mrb[7].mxu1  ;;  %v2196_v35 = vpop.f32.mrb[9].mxu0 }
 0x58a   :  { %v421_v36 = vpop.f32.mrb[10].mxu0  ;;  %v2016_v34 = vld [vmem:[%s3024_s7] ss:$0 sm:$0xff] }
 0x58b   :  { %v2197_v37 = vpop.f32.mrb[11].mxu0 }
 0x58e   :  { %v468_v38 = vpop.f32.mrb[8].mxu1 }
 0x58f   :  { %v524_v40 = vmul.f32 0.25, %v468_v38  ;;  %v2202_v41 = vpop.f32.mrb[9].mxu1 }
 0x590   :  { %v471_v43 = vpop.f32.mrb[10].mxu1  ;;  %v518_v44 = vpop.f32.mrb[12].mxu0 }
 0x591   :  { %v525_v45 = vmul.f32 0.25, %v518_v44  ;;  %v2203_v46 = vpop.f32.mrb[11].mxu1  ;;  %v2208_v47 = vpop.f32.mrb[13].mxu0  ;;  %v526_v49 = vadd.f32 %v2658_v48, %v524_v40 }
 0x592   :  { %v521_v50 = vpop.f32.mrb[14].mxu0 }
 0x593   :  { %v2209_v51 = vpop.f32.mrb[15].mxu0  ;;  %v528_v52 = vsel %vm302_vm3, %v526_v49, -inf  ;;  %v527_v54 = vadd.f32 %v2663_v53, %v525_v45 }
 0x594   :  { %529 = vmax.xlane.f32.xlu0 %v528_v52 }
 0x595   :  { %v531_v55 = vsel %vm302_vm3, %v527_v54, -inf }
 0x596   :  { %532 = vmax.xlane.f32.xlu1 %v531_v55 }
 0x5a7   :  { %600 = vrot.lane.b32.xlu1 %v2637_v42, %s2485_s0 }
 0x621   :  { %v530_v56 = vpop.xlane.xlu0 %529 }
 0x622   :  { %v534_v57 = vsub.f32 %v526_v49, %v530_v56  ;;  %v2374_v56 = vld [vmem:[%s3027_s10 + $0x8] sm:$0xff]  }
 0x623   :  { %v533_v58 = vpop.xlane.xlu1 %532 }
 0x624   :  { %v536_v59 = vmul.f32 1.442695, %v534_v57  ;;  %v535_v60 = vsub.f32 %v527_v54, %v533_v58 }
 0x626   :  { %2405 = vpow2.f32 %v536_v59  ;;  %v538_v61 = vmul.f32 1.442695, %v535_v60 }
 0x627   :  { %v601_v62 = vpop.permute.xlu1 %600 }
 0x628   :  { %2407 = vpow2.f32 %v538_v61  ;;  %v606_v63 = vsel %vm332_vm4, %v601_v62, 0 }
 0x629   :  { %2217 = vmatpush3.bf16.msra.mxu0 %v606_v63 }
 0x62a   :  { %2230 = vmatprep.subr.bf16.mxu0 %v2479_v15 }
 0x630   :  { %v2406_v0 = vpop.eup %2405 }
 0x631   :  { %v540_v1 = vsel %vm302_vm3, %v2406_v0, 0.0 }
 0x632   :  { %v2408_v2 = vpop.eup %2407  ;;  %541 = vadd.xlane.f32.xlu0 %v540_v1  ;;  %v2020_v1 = vld [vmem:[%s3025_s8] ss:$0 sm:$0xff] }
 0x633   :  { %v543_v42 = vsel %vm302_vm3, %v2408_v2, 0.0 }
 0x636   :  { %544 = vadd.xlane.f32.xlu0 %v543_v42 }
 0x64c   :  { %552 = vrot.lane.b32.xlu0 %v2635_v39, %s2485_s0 }
 0x6bf   :  { %v542_v3 = vpop.xlane.xlu0 %541 }
 0x6c0   :  { %2409 = vrcp.f32 %v542_v3 }
 0x6c3   :  { %v545_v4 = vpop.xlane.xlu0 %544 }
 0x6c4   :  { %2411 = vrcp.f32 %v545_v4  ;;  %v2021_v4 = vld [vmem:[%s3026_s9] ss:$0 sm:$0xff] }
 0x6c7   :  { %v553_v5 = vpop.permute.xlu0 %552 }
 0x6c8   :  { %v558_v6 = vsel %vm332_vm4, %v553_v5, 0 }
 0x6c9   :  { %2211 = vmatpush3.bf16.msra.mxu1 %v558_v6 }
 0x6ca   :  { %v2410_v7 = vpop.eup %2409  ;;  %2222 = vmatprep.subr.bf16.mxu1 %v2479_v15 }
 0x6cb   :  { %v548_v8 = vmul.f32 %v2410_v7, %v2406_v0 }
 0x6cd   :  { %v550_v9 = vpack.c.bf16 %v548_v8, %v548_v8 }
 0x6ce   :  { %v2412_v10 = vpop.eup %2411 }
 0x6cf   :  { %v549_v11 = vmul.f32 %v2412_v10, %v2408_v2  ;;  %2213 = vmatmul.mubr.msk.bf16.vlgmr.msra.gmra.mrb[12].mxu1 %vm302_vm3, %v550_v9  ;;  %v2375_v9 = vld [vmem:[%s3029_s12] sm:$0xff]   ;;  %v2376_v10 = vld [vmem:[%s3029_s12 + $0x8] sm:$0xff]  }
 0x6d0   :  { %2226 = vmatprep.mubr.msk.bf16.mxu1 %vm2480_vm1, %v2479_v15  ;;  %2223 = vmatpush3.bf16.msra.mxu1 %v2371_v12  ;;  %v2022_v12 = vld [vmem:[%s3028_s11] ss:$0 sm:$0xff] }
 0x6d1   :  { %v551_v39 = vpack.c.bf16 %v549_v11, %v549_v11  ;;  %2224 = vmatprep.subr.bf16.mxu1 %v2479_v15  ;;  %v2377_v11 = vld [vmem:[%s3029_s12 + $0x10] sm:$0xff]  }
 0x6d3   :  { %2219 = vmatmul.mubr.msk.bf16.vlgmr.msra.gmra.mrb[16].mxu0 %vm302_vm3, %v551_v39  ;;  %v2378_v39 = vld [vmem:[%s3029_s12 + $0x18] sm:$0xff]  }
 0x6d4   :  { %2234 = vmatprep.mubr.msk.bf16.mxu0 %vm2480_vm1, %v2479_v15  ;;  %2225 = vmatpush3.bf16.msra.mxu1 %v2372_v13 }
 0x6d5   :  { %2238 = vmatprep.subr.bf16.mxu1 %v2479_v15 }
 0x7a2   :  { %v594_v14 = vpop.f32.mrb[12].mxu1 }
 0x7a3   :  { %v2214_v16 = vpop.f32.mrb[13].mxu1 }
 0x7a4   :  { %v597_v17 = vpop.f32.mrb[14].mxu1 }
 0x7a5   :  { %v2215_v18 = vpop.f32.mrb[15].mxu1 }
 0x7a6   :  { %v642_v19 = vpop.f32.mrb[16].mxu0 }
 0x7a7   :  { %v2359_v20 = vpack.i.bf16 %v642_v19, %v594_v14  ;;  %v2220_v21 = vpop.f32.mrb[17].mxu0 }
 0x7a8   :  { %v645_v22 = vpop.f32.mrb[18].mxu0 }
 0x7a9   :  { %2360 = vrot.lane.b32.xlu1 %v2359_v20, %s2486_s2  ;;  %v2221_v23 = vpop.f32.mrb[19].mxu0 }
 0x81b   :  { %v2361_v24 = vpop.permute.xlu1 %2360 }
 0x81c   :  { %v2363_v25 = vunpack.i.h.bf16 %v2361_v24  ;;  %v2362_v26 = vunpack.i.l.bf16 %v2361_v24 }
 0x81e   :  { %v657_v27 = vsel %vm190_vm2, %v2705_v33, %v2363_v25  ;;  %v656_v29 = vsel %vm190_vm2, %v2703_v28, %v2362_v26 }
 0x81f   :  { %v662_v30 = vpack.c.bf16 %v657_v27, %v656_v29 }
 0x821   :  { %2227 = vmatmul.mubr.msk.bf16.vlgmr.msra.gmra.mrb[16].mxu1 %vm71_vm0, %v662_v30 }
 0x822   :  { %2246 = vmatprep.mubr.msk.bf16.mxu1 %vm2480_vm1, %v2479_v15  ;;  %2239 = vmatpush3.bf16.msra.mxu1 %v2375_v9 }
 0x823   :  { %2240 = vmatprep.subr.bf16.mxu1 %v2479_v15 }
 0x826   :  { %2241 = vmatpush3.bf16.msra.mxu1 %v2376_v10  ;;  %v2039_v10 = vld [vmem:[%s3022_s5 + $0x1] ss:$0 sm:$0xff] }
 0x827   :  { %2242 = vmatprep.subr.bf16.mxu1 %v2479_v15 }
 0x82a   :  { %2243 = vmatpush3.bf16.msra.mxu1 %v2377_v11 }
 0x82b   :  { %2244 = vmatprep.subr.bf16.mxu1 %v2479_v15 }
 0x82e   :  { %2245 = vmatpush3.bf16.msra.mxu1 %v2378_v39 }
 0x82f   :  { %2264 = vmatprep.subr.bf16.mxu1 %v2479_v15 }
 0x8f4   :  { %v719_v35 = vpop.f32.mrb[16].mxu1 }
 0x8f5   :  { %v720_v36 = vadd.f32 %v2016_v34, %v719_v35  ;;  %v2228_v37 = vpop.f32.mrb[17].mxu1  ;;  %v2026_v35 = vld [vmem:[%s3030_s13] ss:$0 sm:$0xff] }
 0x8f6   :  { %v722_v38 = vpop.f32.mrb[18].mxu1 }
 0x8f7   :  { %v723_v40 = vadd.f32 %v2016_v34, %v722_v38  ;;  %v2229_v41 = vpop.f32.mrb[19].mxu1  ;;  %v726_v33 = vadd.f32 %v720_v36, %v2623_v31 }
 0x8f9   :  { %v730_v28 = vsel %vm71_vm0, %v726_v33, 0.0  ;;  %v727_v43 = vadd.f32 %v723_v40, %v2625_v32  ;;  %v2373_v32 = vld [vmem:[%s3027_s10] sm:$0xff]  }
 0x8fa   :  { %731 = vadd.xlane.f32.xlu1 %v730_v28  ;;  %2231 = vmatpush3.bf16.msra.mxu0 %v2373_v32 }
 0x8fb   :  { %v733_v44 = vsel %vm71_vm0, %v727_v43, 0.0  ;;  %2232 = vmatprep.subr.bf16.mxu0 %v2479_v15 }
 0x8fc   :  { %734 = vadd.xlane.f32.xlu0 %v733_v44 }
 0x8fe   :  { %2233 = vmatpush3.bf16.msra.mxu0 %v2374_v56  ;;  %v2379_v56 = vld [vmem:[%s3047_s26 + $0x10] sm:$0xff]  }
 0x8ff   :  { %2250 = vmatprep.subr.bf16.mxu0 %v2479_v15 }
 0x987   :  { %v732_v45 = vpop.xlane.xlu1 %731 }
 0x988   :  { %v736_v46 = vmul.f32 0.03125, %v732_v45 }
 0x989   :  { %v735_v47 = vpop.xlane.xlu0 %734 }
 0x98a   :  { %v738_v49 = vsub.f32 %v726_v33, %v736_v46  ;;  %v737_v50 = vmul.f32 0.03125, %v735_v47 }
 0x98c   :  { %v739_v51 = vsub.f32 %v727_v43, %v737_v50  ;;  %v740_v52 = vmul.f32 %v738_v49, %v738_v49 }
 0x98e   :  { %v742_v54 = vsel %vm71_vm0, %v740_v52, 0.0  ;;  %v741_v55 = vmul.f32 %v739_v51, %v739_v51 }
 0x98f   :  { %743 = vadd.xlane.f32.xlu0 %v742_v54 }
 0x990   :  { %v745_v31 = vsel %vm71_vm0, %v741_v55, 0.0 }
 0x993   :  { %746 = vadd.xlane.f32.xlu0 %v745_v31 }
 0xa1c   :  { %v744_v57 = vpop.xlane.xlu0 %743 }
 0xa1d   :  { %v748_v58 = vmul.f32 0.03125, %v744_v57  ;;  %v2380_v57 = vld [vmem:[%s3047_s26 + $0x18] sm:$0xff]  }
 0xa1f   :  { %v750_v59 = vadd.f32 1e-12, %v748_v58 }
 0xa20   :  { %v747_v60 = vpop.xlane.xlu0 %746 }
 0xa21   :  { %2413 = vrsqrt.f32 %v750_v59  ;;  %v749_v61 = vmul.f32 0.03125, %v747_v60 }
 0xa23   :  { %v751_v62 = vadd.f32 1e-12, %v749_v61 }
 0xa25   :  { %2415 = vrsqrt.f32 %v751_v62 }
 0xa2b   :  { %v2414_v63 = vpop.eup %2413 }
 0xa2c   :  { %v754_v0 = vmul.f32 %v2414_v63, %v738_v49 }
 0xa2e   :  { %v762_v42 = vmul.f32 %v2020_v1, %v754_v0 }
 0xa2f   :  { %v2416_v2 = vpop.eup %2415 }
 0xa30   :  { %v755_v3 = vmul.f32 %v2416_v2, %v739_v51  ;;  %v770_v6 = vadd.f32 %v2021_v4, %v762_v42 }
 0xa32   :  { %v763_v5 = vmul.f32 %v2020_v1, %v755_v3  ;;  %v2032_v1 = vld [vmem:[%s3031_s14] ss:$0 sm:$0xff] }
 0xa34   :  { %v771_v7 = vadd.f32 %v2021_v4, %v763_v5  ;;  %v2033_v5 = vld [vmem:[%s3032_s15] ss:$0 sm:$0xff] }
 0xa36   :  { %v776_v8 = vpack.c.bf16 %v771_v7, %v770_v6 }
 0xa38   :  { %2235 = vmatmul.mubr.msk.bf16.vlgmr.msra.gmra.mrb[20].mxu0 %vm71_vm0, %v776_v8 }
 0xa39   :  { %2254 = vmatprep.mubr.msk.bf16.mxu0 %vm2480_vm1, %v2479_v15  ;;  %2251 = vmatpush3.bf16.msra.mxu0 %v2379_v56 }
 0xa3a   :  { %2252 = vmatprep.subr.bf16.mxu0 %v2479_v15 }
 0xa3d   :  { %2253 = vmatpush3.bf16.msra.mxu0 %v2380_v57 }
 0xa3e   :  { %2258 = vmatprep.subr.bf16.mxu0 %v2479_v15 }
 0xb0b   :  { %v833_v13 = vpop.f32.mrb[20].mxu0 }
 0xb0c   :  { %v834_v14 = vadd.f32 %v2022_v12, %v833_v13  ;;  %v2236_v16 = vpop.f32.mrb[21].mxu0 }
 0xb0d   :  { %v836_v17 = vpop.f32.mrb[22].mxu0 }
 0xb0e   :  { %v842_v18 = vmul.f32 0.70710677, %v834_v14  ;;  %v837_v19 = vadd.f32 %v2022_v12, %v836_v17  ;;  %v2237_v20 = vpop.f32.mrb[23].mxu0  ;;  %v840_v25 = vmul.f32 0.5, %v834_v14 }
 0xb10   :  { %2417 = verf.f32 %v842_v18  ;;  %v843_v21 = vmul.f32 0.70710677, %v837_v19  ;;  %v841_v26 = vmul.f32 0.5, %v837_v19 }
 0xb12   :  { %2419 = verf.f32 %v843_v21 }
 0xb1a   :  { %v2418_v22 = vpop.eup %2417 }
 0xb1b   :  { %v846_v23 = vadd.f32 1.0, %v2418_v22 }
 0xb1c   :  { %v2420_v24 = vpop.eup %2419 }
 0xb1d   :  { %v847_v27 = vadd.f32 1.0, %v2420_v24  ;;  %v848_v29 = vmul.f32 %v846_v23, %v840_v25 }
 0xb1f   :  { %v849_v30 = vmul.f32 %v847_v27, %v841_v26 }
 0xb21   :  { %v858_v34 = vpack.c.bf16 %v849_v30, %v848_v29 }
 0xb23   :  { %2247 = vmatmul.mubr.msk.bf16.vlgmr.msra.gmra.mrb[20].mxu1 %vm890_vm5, %v858_v34 }
 0xb24   :  { %2266 = vmatprep.mubr.msk.bf16.mxu1 %vm2480_vm1, %v2479_v15 }
 0xbf6   :  { %v928_v36 = vpop.f32.mrb[20].mxu1 }
 0xbf7   :  { %v929_v37 = vadd.f32 %v2026_v35, %v928_v36  ;;  %v2248_v38 = vpop.f32.mrb[21].mxu1 }
 0xbf8   :  { %v931_v40 = vpop.f32.mrb[22].mxu1 }
 0xbf9   :  { %v932_v41 = vadd.f32 %v2026_v35, %v931_v40  ;;  %v2249_v33 = vpop.f32.mrb[23].mxu1  ;;  %v935_v28 = vadd.f32 %v929_v37, %v770_v6 }
 0xbfb   :  { %v939_v43 = vsel %vm71_vm0, %v935_v28, 0.0  ;;  %v936_v44 = vadd.f32 %v932_v41, %v771_v7 }
 0xbfc   :  { %940 = vadd.xlane.f32.xlu1 %v939_v43 }
 0xbfd   :  { %v942_v45 = vsel %vm71_vm0, %v936_v44, 0.0 }
 0xbfe   :  { %943 = vadd.xlane.f32.xlu0 %v942_v45 }
 0xc89   :  { %v941_v46 = vpop.xlane.xlu1 %940 }
 0xc8a   :  { %v945_v47 = vmul.f32 0.03125, %v941_v46 }
 0xc8b   :  { %v944_v49 = vpop.xlane.xlu0 %943 }
 0xc8c   :  { %v947_v50 = vsub.f32 %v935_v28, %v945_v47  ;;  %v946_v51 = vmul.f32 0.03125, %v944_v49 }
 0xc8e   :  { %v948_v52 = vsub.f32 %v936_v44, %v946_v51  ;;  %v949_v54 = vmul.f32 %v947_v50, %v947_v50 }
 0xc90   :  { %v951_v55 = vsel %vm71_vm0, %v949_v54, 0.0  ;;  %v950_v31 = vmul.f32 %v948_v52, %v948_v52 }
 0xc91   :  { %952 = vadd.xlane.f32.xlu1 %v951_v55 }
 0xc92   :  { %v954_v32 = vsel %vm71_vm0, %v950_v31, 0.0 }
 0xc93   :  { %955 = vadd.xlane.f32.xlu0 %v954_v32 }
 0xd1e   :  { %v953_v58 = vpop.xlane.xlu1 %952 }
 0xd1f   :  { %v957_v59 = vmul.f32 0.03125, %v953_v58 }
 0xd20   :  { %v956_v60 = vpop.xlane.xlu0 %955 }
 0xd21   :  { %v959_v61 = vadd.f32 1e-12, %v957_v59  ;;  %v958_v62 = vmul.f32 0.03125, %v956_v60 }
 0xd23   :  { %2421 = vrsqrt.f32 %v959_v61  ;;  %v960_v63 = vadd.f32 1e-12, %v958_v62 }
 0xd25   :  { %2423 = vrsqrt.f32 %v960_v63 }
 0xd2d   :  { %v2422_v0 = vpop.eup %2421 }
 0xd2e   :  { %v963_v2 = vmul.f32 %v2422_v0, %v947_v50 }
 0xd2f   :  { %v2424_v42 = vpop.eup %2423 }
 0xd30   :  { %v971_v3 = vmul.f32 %v2032_v1, %v963_v2  ;;  %v964_v4 = vmul.f32 %v2424_v42, %v948_v52 }
 0xd32   :  { %v972_v6 = vmul.f32 %v2032_v1, %v964_v4  ;;  %v2812_v7 = vadd.f32 %v2033_v5, %v971_v3 }
 0xd34   :  { %v2814_v8 = vadd.f32 %v2033_v5, %v972_v6 }
 0xd36   :  { %v986_v9 = vpack.c.bf16 %v2814_v8, %v2812_v7 }
 0xd38   :  { %2255 = vmatmul.mubr.msk.bf16.vlgmr.msra.gmra.mrb[24].mxu0 %vm71_vm0, %v986_v9 }
 0xd39   :  { %2260 = vmatprep.mubr.msk.bf16.mxu0 %vm2480_vm1, %v2479_v15 }
 0xe0b   :  { %v1044_v11 = vpop.f32.mrb[24].mxu0 }
 0xe0c   :  { %v1045_v39 = vadd.f32 %v2039_v10, %v1044_v11  ;;  %v2256_v12 = vpop.f32.mrb[25].mxu0 }
 0xe0d   :  { %v1047_v13 = vpop.f32.mrb[26].mxu0 }
 0xe0e   :  { %v2824_v14 = vpack.c.bf16 %v1045_v39, %v1045_v39  ;;  %v1048_v16 = vadd.f32 %v2039_v10, %v1047_v13  ;;  %v2257_v17 = vpop.f32.mrb[27].mxu0 }
 0xe10   :  { %v2826_v18 = vpack.c.bf16 %v1048_v16, %v1048_v16  ;;  %1054 = vrot.lane.b32.xlu1 %v2824_v14, %s2481_s24 }
 0xe12   :  { %1103 = vrot.lane.b32.xlu0 %v2826_v18, %s2481_s24 }
 0xe82   :  { %v1055_v19 = vpop.permute.xlu1 %1054 }
 0xe83   :  { %v1060_v20 = vsel %vm190_vm2, %v1055_v19, 0 }
 0xe84   :  { %2259 = vmatpush3.bf16.xpose.msra.mxu0 %v1060_v20  ;;  %v1104_v21 = vpop.permute.xlu0 %1103 }
 0xe85   :  { %v1109_v22 = vsel %vm190_vm2, %v1104_v21, 0  ;;  %2270 = vmatprep.subr.bf16.mxu0 %v2479_v15 }
 0xe86   :  { %2265 = vmatpush3.bf16.xpose.msra.mxu1 %v1109_v22 }
 0xe87   :  { %2276 = vmatprep.subr.bf16.mxu1 %v2479_v15 }
 0xe8b   :  { %2261 = vmatmul.mubr.msk.bf16.vlgmr.msra.gmra.mrb[28].mxu0 %vm190_vm2, %v2824_v14 }
 0xe8c   :  { %2272 = vmatprep.mubr.msk.bf16.mxu0 %vm2480_vm1, %v2479_v15 }
 0xe8d   :  { %2267 = vmatmul.mubr.msk.bf16.vlgmr.msra.gmra.mrb[24].mxu1 %vm190_vm2, %v2826_v18 }
 0xe8e   :  { %2278 = vmatprep.mubr.msk.bf16.mxu1 %vm2480_vm1, %v2479_v15 }
 0xf5e   :  { %v1096_v23 = vpop.f32.mrb[28].mxu0 }
 0xf5f   :  { %v1151_v24 = vmul.f32 0.25, %v1096_v23  ;;  %v2262_v25 = vpop.f32.mrb[29].mxu0 }
 0xf60   :  { %v1099_v26 = vpop.f32.mrb[30].mxu0  ;;  %v1145_v27 = vpop.f32.mrb[24].mxu1 }
 0xf61   :  { %v1152_v29 = vmul.f32 0.25, %v1145_v27  ;;  %v2263_v30 = vpop.f32.mrb[31].mxu0  ;;  %v2268_v34 = vpop.f32.mrb[25].mxu1  ;;  %v1153_v35 = vadd.f32 %v2658_v48, %v1151_v24 }
 0xf62   :  { %v1148_v36 = vpop.f32.mrb[26].mxu1 }
 0xf63   :  { %v2269_v37 = vpop.f32.mrb[27].mxu1  ;;  %v1155_v38 = vsel %vm302_vm3, %v1153_v35, -inf  ;;  %v1154_v40 = vadd.f32 %v2663_v53, %v1152_v29 }
 0xf64   :  { %1156 = vmax.xlane.f32.xlu1 %v1155_v38 }
 0xf65   :  { %v1158_v41 = vsel %vm302_vm3, %v1154_v40, -inf }
 0xf66   :  { %1159 = vmax.xlane.f32.xlu0 %v1158_v41 }
 0xf75   :  { %1179 = vrot.lane.b32.xlu1 %v2824_v14, %s2482_s4 }
 0xff1   :  { %v1157_v33 = vpop.xlane.xlu1 %1156 }
 0xff2   :  { %v1161_v28 = vsub.f32 %v1153_v35, %v1157_v33 }
 0xff3   :  { %v1160_v43 = vpop.xlane.xlu0 %1159 }
 0xff4   :  { %v1163_v44 = vmul.f32 1.442695, %v1161_v28  ;;  %v1162_v45 = vsub.f32 %v1154_v40, %v1160_v43 }
 0xff5   :  { %v1180_v46 = vpop.permute.xlu1 %1179 }
 0xff6   :  { %2425 = vpow2.f32 %v1163_v44  ;;  %v1165_v47 = vmul.f32 1.442695, %v1162_v45  ;;  %v1185_v49 = vsel %vm332_vm4, %v1180_v46, 0 }
 0xff7   :  { %2271 = vmatpush3.bf16.msra.mxu0 %v1185_v49 }
 0xff8   :  { %2427 = vpow2.f32 %v1165_v47  ;;  %2282 = vmatprep.subr.bf16.mxu0 %v2479_v15 }
0x1000   :  { %v2426_v50 = vpop.eup %2425 }
0x1001   :  { %v1167_v51 = vsel %vm302_vm3, %v2426_v50, 0.0 }
0x1002   :  { %v2428_v52 = vpop.eup %2427  ;;  %1168 = vadd.xlane.f32.xlu1 %v1167_v51 }
0x1003   :  { %v1170_v54 = vsel %vm302_vm3, %v2428_v52, 0.0 }
0x1004   :  { %1171 = vadd.xlane.f32.xlu0 %v1170_v54  ;;  %v2381_v54 = vld [vmem:[%s3023_s6 + $0x10] sm:$0xff]  }
0x1013   :  { %1277 = vrot.lane.b32.xlu1 %v2824_v14, %s2483_s29 }
0x1017   :  { %1327 = vrot.lane.b32.xlu1 %v2826_v18, %s2483_s29 }
0x101a   :  { %1227 = vrot.lane.b32.xlu0 %v2826_v18, %s2482_s4 }
0x101b   :  { %1275 = vrot.lane.b32.xlu1 %v2824_v14, %s2484_s30 }
0x101e   :  { %1325 = vrot.lane.b32.xlu0 %v2826_v18, %s2484_s30 }
0x108f   :  { %v1169_v55 = vpop.xlane.xlu1 %1168 }
0x1090   :  { %2429 = vrcp.f32 %v1169_v55  ;;  %v2382_v55 = vld [vmem:[%s3023_s6 + $0x18] sm:$0xff]  }
0x1091   :  { %v1172_v31 = vpop.xlane.xlu0 %1171 }
0x1092   :  { %2431 = vrcp.f32 %v1172_v31 }
0x1093   :  { %v1278_v57 = vpop.permute.xlu1 %1277 }
0x1094   :  { %v1283_v0 = vsel %vm190_vm2, %v1278_v57, 0 }
0x1095   :  { %v1228_v32 = vpop.permute.xlu0 %1227 }
0x1096   :  { %v1233_v56 = vsel %vm332_vm4, %v1228_v32, 0 }
0x1097   :  { %2277 = vmatpush3.bf16.msra.mxu1 %v1233_v56  ;;  %v1328_v63 = vpop.permute.xlu1 %1327 }
0x1098   :  { %2288 = vmatprep.subr.bf16.mxu1 %v2479_v15  ;;  %v1333_v2 = vsel %vm190_vm2, %v1328_v63, 0 }
0x1099   :  { %v1326_v3 = vpop.permute.xlu0 %1325 }
0x109a   :  { %v2430_v58 = vpop.eup %2429 }
0x109b   :  { %v1175_v59 = vmul.f32 %v2430_v58, %v2426_v50  ;;  %v1276_v42 = vpop.permute.xlu1 %1275 }
0x109c   :  { %v2432_v60 = vpop.eup %2431 }
0x109d   :  { %v1176_v61 = vmul.f32 %v2432_v60, %v2428_v52  ;;  %v1177_v62 = vpack.c.bf16 %v1175_v59, %v1175_v59 }
0x109f   :  { %2273 = vmatmul.mubr.msk.bf16.vlgmr.msra.gmra.mrb[32].mxu0 %vm302_vm3, %v1177_v62  ;;  %v1178_v1 = vpack.c.bf16 %v1176_v61, %v1176_v61 }
0x10a0   :  { %2283 = vmatpush3.bf16.xpose.msra.mxu0 %v1283_v0  ;;  %2284 = vmatprep.mubr.msk.bf16.mxu0 %vm2480_vm1, %v2479_v15 }
0x10a1   :  { %2279 = vmatmul.mubr.msk.bf16.vlgmr.msra.gmra.mrb[28].mxu1 %vm302_vm3, %v1178_v1  ;;  %2294 = vmatprep.subr.bf16.mxu0 %v2479_v15 }
0x10a2   :  { %2289 = vmatpush3.bf16.xpose.msra.mxu1 %v1333_v2  ;;  %2290 = vmatprep.mubr.msk.bf16.mxu1 %vm2480_vm1, %v2479_v15 }
0x10a3   :  { %2300 = vmatprep.subr.bf16.mxu1 %v2479_v15 }
0x10a7   :  { %2285 = vmatmul.mubr.msk.bf16.vlgmr.msra.gmra.mrb[36].mxu0 %vm190_vm2, %v1276_v42 }
0x10a8   :  { %2296 = vmatprep.mubr.msk.bf16.mxu0 %vm2480_vm1, %v2479_v15 }
0x10a9   :  { %2291 = vmatmul.mubr.msk.bf16.vlgmr.msra.gmra.mrb[32].mxu1 %vm190_vm2, %v1326_v3 }
0x10aa   :  { %2302 = vmatprep.mubr.msk.bf16.mxu1 %vm2480_vm1, %v2479_v15 }
0x1172   :  { %v2882_v4 = vpop.f32.mrb[32].mxu0 }
0x1173   :  { %v2274_v5 = vpop.f32.mrb[33].mxu0 }
0x1174   :  { %v1224_v6 = vpop.f32.mrb[34].mxu0  ;;  %v2884_v9 = vpop.f32.mrb[28].mxu1  ;;  %v2056_v5 = vld [vmem:[%s3024_s7 + $0x1] ss:$0 sm:$0xff] }
0x1175   :  { %v2275_v10 = vpop.f32.mrb[35].mxu0  ;;  %v2280_v11 = vpop.f32.mrb[29].mxu1 }
0x1176   :  { %v1272_v39 = vpop.f32.mrb[30].mxu1 }
0x1177   :  { %v2281_v12 = vpop.f32.mrb[31].mxu1 }
0x117a   :  { %v1319_v13 = vpop.f32.mrb[36].mxu0 }
0x117b   :  { %v1375_v16 = vmul.f32 0.25, %v1319_v13  ;;  %v2286_v17 = vpop.f32.mrb[37].mxu0 }
0x117c   :  { %v1322_v19 = vpop.f32.mrb[38].mxu0  ;;  %v1369_v20 = vpop.f32.mrb[32].mxu1 }
0x117d   :  { %v1376_v21 = vmul.f32 0.25, %v1369_v20  ;;  %v2287_v22 = vpop.f32.mrb[39].mxu0  ;;  %v2292_v23 = vpop.f32.mrb[33].mxu1  ;;  %v1377_v24 = vadd.f32 %v2658_v48, %v1375_v16 }
0x117e   :  { %v1372_v25 = vpop.f32.mrb[34].mxu1 }
0x117f   :  { %v2293_v26 = vpop.f32.mrb[35].mxu1  ;;  %v1379_v27 = vsel %vm302_vm3, %v1377_v24, -inf  ;;  %v1378_v29 = vadd.f32 %v2663_v53, %v1376_v21 }
0x1180   :  { %1380 = vmax.xlane.f32.xlu1 %v1379_v27 }
0x1181   :  { %v1382_v30 = vsel %vm302_vm3, %v1378_v29, -inf }
0x1182   :  { %1383 = vmax.xlane.f32.xlu0 %v1382_v30 }
0x1191   :  { %1403 = vrot.lane.b32.xlu1 %v2824_v14, %s2485_s0 }
0x120d   :  { %v1381_v34 = vpop.xlane.xlu1 %1380 }
0x120e   :  { %v1385_v35 = vsub.f32 %v1377_v24, %v1381_v34 }
0x120f   :  { %v1384_v36 = vpop.xlane.xlu0 %1383 }
0x1210   :  { %v1387_v37 = vmul.f32 1.442695, %v1385_v35  ;;  %v1386_v38 = vsub.f32 %v1378_v29, %v1384_v36  ;;  %v2384_v29 = vld [vmem:[%s3027_s10 + $0x18] sm:$0xff]  }
0x1211   :  { %v1404_v40 = vpop.permute.xlu1 %1403 }
0x1212   :  { %2433 = vpow2.f32 %v1387_v37  ;;  %v1389_v48 = vmul.f32 1.442695, %v1386_v38  ;;  %v1409_v41 = vsel %vm332_vm4, %v1404_v40, 0 }
0x1213   :  { %2295 = vmatpush3.bf16.msra.mxu0 %v1409_v41 }
0x1214   :  { %2435 = vpow2.f32 %v1389_v48  ;;  %2306 = vmatprep.subr.bf16.mxu0 %v2479_v15  ;;  %v2062_v48 = vld [vmem:[%s3025_s8 + $0x1] ss:$0 sm:$0xff] }
0x121c   :  { %v2434_v53 = vpop.eup %2433 }
0x121d   :  { %v1391_v33 = vsel %vm302_vm3, %v2434_v53, 0.0 }
0x121e   :  { %v2436_v28 = vpop.eup %2435  ;;  %1392 = vadd.xlane.f32.xlu0 %v1391_v33 }
0x121f   :  { %v1394_v14 = vsel %vm302_vm3, %v2436_v28, 0.0 }
0x1222   :  { %1395 = vadd.xlane.f32.xlu0 %v1394_v14  ;;  %v2063_v14 = vld [vmem:[%s3026_s9 + $0x1] ss:$0 sm:$0xff] }
0x1238   :  { %1451 = vrot.lane.b32.xlu0 %v2826_v18, %s2485_s0 }
0x12ab   :  { %v1393_v43 = vpop.xlane.xlu0 %1392 }
0x12ac   :  { %2437 = vrcp.f32 %v1393_v43 }
0x12af   :  { %v1396_v44 = vpop.xlane.xlu0 %1395 }
0x12b0   :  { %2439 = vrcp.f32 %v1396_v44 }
0x12b3   :  { %v1452_v45 = vpop.permute.xlu0 %1451 }
0x12b4   :  { %v1457_v46 = vsel %vm332_vm4, %v1452_v45, 0 }
0x12b5   :  { %2301 = vmatpush3.bf16.msra.mxu1 %v1457_v46 }
0x12b6   :  { %v2438_v47 = vpop.eup %2437  ;;  %2314 = vmatprep.subr.bf16.mxu1 %v2479_v15 }
0x12b7   :  { %v1399_v49 = vmul.f32 %v2438_v47, %v2434_v53  ;;  %v2385_v47 = vld [vmem:[%s3029_s12 + $0x20] sm:$0xff]  }
0x12b9   :  { %v1401_v50 = vpack.c.bf16 %v1399_v49, %v1399_v49  ;;  %v2386_v49 = vld [vmem:[%s3029_s12 + $0x28] sm:$0xff]  }
0x12ba   :  { %v2440_v51 = vpop.eup %2439 }
0x12bb   :  { %v1400_v52 = vmul.f32 %v2440_v51, %v2436_v28  ;;  %2297 = vmatmul.mubr.msk.bf16.vlgmr.msra.gmra.mrb[40].mxu0 %vm302_vm3, %v1401_v50  ;;  %v2387_v50 = vld [vmem:[%s3029_s12 + $0x30] sm:$0xff]   ;;  %v2388_v51 = vld [vmem:[%s3029_s12 + $0x38] sm:$0xff]  }
0x12bc   :  { %2310 = vmatprep.mubr.msk.bf16.mxu0 %vm2480_vm1, %v2479_v15  ;;  %2307 = vmatpush3.bf16.msra.mxu0 %v2381_v54 }
0x12bd   :  { %v1402_v18 = vpack.c.bf16 %v1400_v52, %v1400_v52  ;;  %2308 = vmatprep.subr.bf16.mxu0 %v2479_v15  ;;  %v2069_v52 = vld [vmem:[%s3028_s11 + $0x1] ss:$0 sm:$0xff] }
0x12bf   :  { %2303 = vmatmul.mubr.msk.bf16.vlgmr.msra.gmra.mrb[36].mxu1 %vm302_vm3, %v1402_v18 }
0x12c0   :  { %2318 = vmatprep.mubr.msk.bf16.mxu1 %vm2480_vm1, %v2479_v15  ;;  %2309 = vmatpush3.bf16.msra.mxu0 %v2382_v55 }
0x12c1   :  { %2322 = vmatprep.subr.bf16.mxu0 %v2479_v15 }
0x138e   :  { %v1445_v31 = vpop.f32.mrb[40].mxu0 }
0x138f   :  { %v2298_v32 = vpop.f32.mrb[41].mxu0 }
0x1390   :  { %v1448_v56 = vpop.f32.mrb[42].mxu0 }
0x1391   :  { %v2299_v57 = vpop.f32.mrb[43].mxu0 }
0x1392   :  { %v1493_v58 = vpop.f32.mrb[36].mxu1 }
0x1393   :  { %v2364_v59 = vpack.i.bf16 %v1493_v58, %v1445_v31  ;;  %v2304_v60 = vpop.f32.mrb[37].mxu1 }
0x1394   :  { %v1496_v61 = vpop.f32.mrb[38].mxu1 }
0x1395   :  { %v2305_v62 = vpop.f32.mrb[39].mxu1  ;;  %2365 = vrot.lane.b32.xlu1 %v2364_v59, %s2486_s2 }
0x1407   :  { %v2366_v63 = vpop.permute.xlu1 %2365 }
0x1408   :  { %v2368_v0 = vunpack.i.h.bf16 %v2366_v63  ;;  %v2367_v1 = vunpack.i.l.bf16 %v2366_v63 }
0x140a   :  { %v1508_v2 = vsel %vm190_vm2, %v2884_v9, %v2368_v0  ;;  %v1507_v42 = vsel %vm190_vm2, %v2882_v4, %v2367_v1 }
0x140b   :  { %v1514_v3 = vpack.c.bf16 %v1508_v2, %v1507_v42 }
0x140d   :  { %2311 = vmatmul.mubr.msk.bf16.vlgmr.msra.gmra.mrb[44].mxu0 %vm71_vm0, %v1514_v3  ;;  %v2082_v3 = vld [vmem:[%s3030_s13 + $0x1] ss:$0 sm:$0xff] }
0x140e   :  { %2330 = vmatprep.mubr.msk.bf16.mxu0 %vm2480_vm1, %v2479_v15  ;;  %2323 = vmatpush3.bf16.msra.mxu0 %v2385_v47 }
0x140f   :  { %2324 = vmatprep.subr.bf16.mxu0 %v2479_v15 }
0x1412   :  { %2325 = vmatpush3.bf16.msra.mxu0 %v2386_v49 }
0x1413   :  { %2326 = vmatprep.subr.bf16.mxu0 %v2479_v15 }
0x1416   :  { %2327 = vmatpush3.bf16.msra.mxu0 %v2387_v50 }
0x1417   :  { %2328 = vmatprep.subr.bf16.mxu0 %v2479_v15 }
0x141a   :  { %2329 = vmatpush3.bf16.msra.mxu0 %v2388_v51 }
0x14e0   :  { %v1572_v6 = vpop.f32.mrb[44].mxu0 }
0x14e1   :  { %v1573_v10 = vadd.f32 %v2056_v5, %v1572_v6  ;;  %v2312_v11 = vpop.f32.mrb[45].mxu0 }
0x14e2   :  { %v1575_v39 = vpop.f32.mrb[46].mxu0 }
0x14e3   :  { %v1576_v12 = vadd.f32 %v2056_v5, %v1575_v39  ;;  %v2313_v13 = vpop.f32.mrb[47].mxu0  ;;  %v1579_v9 = vadd.f32 %v1573_v10, %v2812_v7 }
0x14e5   :  { %v1585_v4 = vsel %vm71_vm0, %v1579_v9, 0.0  ;;  %v1580_v16 = vadd.f32 %v1576_v12, %v2814_v8  ;;  %v2383_v8 = vld [vmem:[%s3027_s10 + $0x10] sm:$0xff]  }
0x14e6   :  { %1586 = vadd.xlane.f32.xlu1 %v1585_v4  ;;  %2315 = vmatpush3.bf16.msra.mxu1 %v2383_v8  ;;  %v2390_v8 = vld [vmem:[%s3033_s16 + $0x8] sm:$0xff]  }
0x14e7   :  { %v1588_v17 = vsel %vm71_vm0, %v1580_v16, 0.0  ;;  %2316 = vmatprep.subr.bf16.mxu1 %v2479_v15 }
0x14e8   :  { %1589 = vadd.xlane.f32.xlu0 %v1588_v17 }
0x14ea   :  { %2317 = vmatpush3.bf16.msra.mxu1 %v2384_v29 }
0x14eb   :  { %2334 = vmatprep.subr.bf16.mxu1 %v2479_v15 }
0x1573   :  { %v1587_v19 = vpop.xlane.xlu1 %1586 }
0x1574   :  { %v1591_v20 = vmul.f32 0.03125, %v1587_v19 }
0x1575   :  { %v1590_v21 = vpop.xlane.xlu0 %1589 }
0x1576   :  { %v1593_v22 = vsub.f32 %v1579_v9, %v1591_v20  ;;  %v1592_v23 = vmul.f32 0.03125, %v1590_v21 }
0x1578   :  { %v1594_v24 = vsub.f32 %v1580_v16, %v1592_v23  ;;  %v1595_v25 = vmul.f32 %v1593_v22, %v1593_v22 }
0x157a   :  { %v1597_v26 = vsel %vm71_vm0, %v1595_v25, 0.0  ;;  %v1596_v27 = vmul.f32 %v1594_v24, %v1594_v24 }
0x157b   :  { %1598 = vadd.xlane.f32.xlu0 %v1597_v26 }
0x157c   :  { %v1600_v7 = vsel %vm71_vm0, %v1596_v27, 0.0 }
0x157d   :  { %1601 = vadd.xlane.f32.xlu1 %v1600_v7  ;;  %v2389_v7 = vld [vmem:[%s3033_s16] sm:$0xff]  }
0x1608   :  { %v1599_v30 = vpop.xlane.xlu0 %1598 }
0x1609   :  { %v1603_v34 = vmul.f32 0.03125, %v1599_v30 }
0x160a   :  { %v1602_v35 = vpop.xlane.xlu1 %1601 }
0x160b   :  { %v1605_v36 = vadd.f32 1e-12, %v1603_v34  ;;  %v1604_v37 = vmul.f32 0.03125, %v1602_v35 }
0x160d   :  { %2441 = vrsqrt.f32 %v1605_v36  ;;  %v1606_v38 = vadd.f32 1e-12, %v1604_v37 }
0x160f   :  { %2443 = vrsqrt.f32 %v1606_v38 }
0x1617   :  { %v2442_v40 = vpop.eup %2441 }
0x1618   :  { %v1609_v41 = vmul.f32 %v2442_v40, %v1593_v22  ;;  %v2090_v40 = vld [vmem:[%s3031_s14 + $0x1] ss:$0 sm:$0xff] }
0x1619   :  { %v2444_v53 = vpop.eup %2443 }
0x161a   :  { %v1617_v33 = vmul.f32 %v2062_v48, %v1609_v41  ;;  %v1610_v28 = vmul.f32 %v2444_v53, %v1594_v24  ;;  %v2091_v53 = vld [vmem:[%s3032_s15 + $0x1] ss:$0 sm:$0xff] }
0x161c   :  { %v1618_v43 = vmul.f32 %v2062_v48, %v1610_v28  ;;  %v1625_v44 = vadd.f32 %v2063_v14, %v1617_v33 }
0x161e   :  { %v1626_v45 = vadd.f32 %v2063_v14, %v1618_v43 }
0x1620   :  { %v1632_v46 = vpack.c.bf16 %v1626_v45, %v1625_v44 }
0x1622   :  { %2319 = vmatmul.mubr.msk.bf16.vlgmr.msra.gmra.mrb[40].mxu1 %vm71_vm0, %v1632_v46 }
0x1623   :  { %2338 = vmatprep.mubr.msk.bf16.mxu1 %vm2480_vm1, %v2479_v15  ;;  %2335 = vmatpush3.bf16.msra.mxu1 %v2389_v7 }
0x1624   :  { %2336 = vmatprep.subr.bf16.mxu1 %v2479_v15 }
0x1627   :  { %2337 = vmatpush3.bf16.msra.mxu1 %v2390_v8 }
0x1628   :  { %2342 = vmatprep.subr.bf16.mxu1 %v2479_v15 }
0x16f5   :  { %v1690_v18 = vpop.f32.mrb[40].mxu1 }
0x16f6   :  { %v1691_v54 = vadd.f32 %v2069_v52, %v1690_v18  ;;  %v2320_v55 = vpop.f32.mrb[41].mxu1  ;;  %v2391_v18 = vld [vmem:[%s3035_s18] sm:$0xff]  }
0x16f7   :  { %v1693_v31 = vpop.f32.mrb[42].mxu1  ;;  %v2092_v55 = vld [vmem:[%s3034_s17] ss:$0 sm:$0xff] }
0x16f8   :  { %v1699_v32 = vmul.f32 0.70710677, %v1691_v54  ;;  %v1694_v56 = vadd.f32 %v2069_v52, %v1693_v31  ;;  %v2321_v57 = vpop.f32.mrb[43].mxu1  ;;  %v1697_v62 = vmul.f32 0.5, %v1691_v54  ;;  %v2392_v54 = vld [vmem:[%s3035_s18 + $0x8] sm:$0xff]   ;;  %s2487_s18 = smov [#allocation2]  }
0x16f9   :  { %s1992_s26 = sshll.u32 %s2487_s18, 4  ;;  %s1993_s26 = int_to_ptr.vmem [resolvable:$true] %s1992_s26 }
0x16fa   :  { %2445 = verf.f32 %v1699_v32  ;;  %v1700_v58 = vmul.f32 0.70710677, %v1694_v56  ;;  %v1698_v63 = vmul.f32 0.5, %v1694_v56  ;;  %s2455_s17 = scalar_lea.vmem %s1993_s26, 32  ;;  %p2460_p1 = scmp.lt.s32.totalorder %s1993_s26, %s1993_s26 }
0x16fb   :  { %p2456_p0 = scmp.ne.s32.totalorder %s1993_s26, %s2455_s17  ;;  %p2461_p2 = scmp.lt.s32.totalorder %s2455_s17, %s2455_s17 }
0x16fc   :  { %2447 = verf.f32 %v1700_v58 }
0x16fd   :  { %p2462_p3 = por %p2461_p2, %p2460_p1 }
0x16ff   :  { %p2463_p4 = pnand %p2462_p3, %p2456_p0 }
0x1704   :  { %v2446_v59 = vpop.eup %2445 }
0x1705   :  { %v1703_v60 = vadd.f32 1.0, %v2446_v59 }
0x1706   :  { %v2448_v61 = vpop.eup %2447 }
0x1707   :  { %v1704_v0 = vadd.f32 1.0, %v2448_v61  ;;  %v1705_v1 = vmul.f32 %v1703_v60, %v1697_v62 }
0x1709   :  { %v1706_v2 = vmul.f32 %v1704_v0, %v1698_v63 }
0x170b   :  { %v1716_v42 = vpack.c.bf16 %v1706_v2, %v1705_v1 }
0x170d   :  { %2331 = vmatmul.mubr.msk.bf16.vlgmr.msra.gmra.mrb[48].mxu0 %vm890_vm5, %v1716_v42 }
0x17e0   :  { %v1786_v5 = vpop.f32.mrb[48].mxu0 }
0x17e1   :  { %v1787_v6 = vadd.f32 %v2082_v3, %v1786_v5  ;;  %v2332_v10 = vpop.f32.mrb[49].mxu0 }
0x17e2   :  { %v1789_v11 = vpop.f32.mrb[50].mxu0 }
0x17e3   :  { %v1790_v39 = vadd.f32 %v2082_v3, %v1789_v11  ;;  %v2333_v12 = vpop.f32.mrb[51].mxu0  ;;  %v1793_v13 = vadd.f32 %v1787_v6, %v1625_v44 }
0x17e5   :  { %v1799_v9 = vsel %vm71_vm0, %v1793_v13, 0.0  ;;  %v1794_v4 = vadd.f32 %v1790_v39, %v1626_v45 }
0x17e6   :  { %1800 = vadd.xlane.f32.xlu1 %v1799_v9 }
0x17e7   :  { %v1802_v16 = vsel %vm71_vm0, %v1794_v4, 0.0 }
0x17e8   :  { %1803 = vadd.xlane.f32.xlu0 %v1802_v16 }
0x1873   :  { %v1801_v17 = vpop.xlane.xlu1 %1800 }
0x1874   :  { %v1805_v19 = vmul.f32 0.03125, %v1801_v17 }
0x1875   :  { %v1804_v20 = vpop.xlane.xlu0 %1803 }
0x1876   :  { %v1807_v21 = vsub.f32 %v1793_v13, %v1805_v19  ;;  %v1806_v22 = vmul.f32 0.03125, %v1804_v20 }
0x1878   :  { %v1808_v23 = vsub.f32 %v1794_v4, %v1806_v22  ;;  %v1809_v24 = vmul.f32 %v1807_v21, %v1807_v21 }
0x187a   :  { %v1811_v25 = vsel %vm71_vm0, %v1809_v24, 0.0  ;;  %v1810_v26 = vmul.f32 %v1808_v23, %v1808_v23 }
0x187b   :  { %1812 = vadd.xlane.f32.xlu1 %v1811_v25 }
0x187c   :  { %v1814_v27 = vsel %vm71_vm0, %v1810_v26, 0.0 }
0x187d   :  { %1815 = vadd.xlane.f32.xlu0 %v1814_v27 }
0x1908   :  { %v1813_v29 = vpop.xlane.xlu1 %1812 }
0x1909   :  { %v1817_v30 = vmul.f32 0.03125, %v1813_v29 }
0x190a   :  { %v1816_v34 = vpop.xlane.xlu0 %1815 }
0x190b   :  { %v1819_v35 = vadd.f32 1e-12, %v1817_v30  ;;  %v1818_v36 = vmul.f32 0.03125, %v1816_v34 }
0x190d   :  { %2449 = vrsqrt.f32 %v1819_v35  ;;  %v1820_v37 = vadd.f32 1e-12, %v1818_v36 }
0x190f   :  { %2451 = vrsqrt.f32 %v1820_v37 }
0x1917   :  { %v2450_v38 = vpop.eup %2449 }
0x1918   :  { %v1823_v48 = vmul.f32 %v2450_v38, %v1807_v21 }
0x1919   :  { %v2452_v41 = vpop.eup %2451 }
0x191a   :  { %v1831_v33 = vmul.f32 %v2090_v40, %v1823_v48  ;;  %v1824_v28 = vmul.f32 %v2452_v41, %v1808_v23 }
0x191c   :  { %v1839_v14 = vadd.f32 %v2091_v53, %v1831_v33  ;;  %v1832_v43 = vmul.f32 %v2090_v40, %v1824_v28 }
0x191e   :  { %v1840_v44 = vadd.f32 %v2091_v53, %v1832_v43  ;;  %v1845_v45 = vpack.c.bf16 %v1839_v14, %v1839_v14 }
0x1920   :  { %v1846_v46 = vpack.c.bf16 %v1840_v44, %v1840_v44  ;;  %v1856_v49 = vunpack.c.l.b16 %v1845_v45 }
0x1922   :  { %v1857_v47 = vunpack.c.l.b16 %v1846_v46 }
0x1924   :  { %v1858_v50 = vrot.slane %v1857_v47, 7 }
0x1926   :  { %v1860_v51 = vsel %vm1859_vm6, %v1858_v50, %v1856_v49 }
0x1927   :  { %v1861_v52 = vpack.c.b16 %v1860_v51, %v1860_v51 }
0x1929   :  { %2339 = vmatmul.mubr.msk.bf16.vlgmr.msra.gmra.mrb[44].mxu1 %vm71_vm0, %v1861_v52 }
0x192a   :  { %2346 = vmatprep.mubr.msk.bf16.mxu1 %vm2480_vm1, %v2479_v15  ;;  %2343 = vmatpush3.bf16.msra.mxu1 %v2391_v18 }
0x192b   :  { %2344 = vmatprep.subr.bf16.mxu1 %v2479_v15  ;;  %v2096_v15 = vld [vmem:[%s3036_s19] ss:$0 sm:$0xff] }
0x192e   :  { %2345 = vmatpush3.bf16.msra.mxu1 %v2392_v54 }
0x19fc   :  { %v1911_v31 = vpop.f32.mrb[44].mxu1 }
0x19fd   :  { %v1912_v32 = vadd.f32 %v2092_v55, %v1911_v31  ;;  %v2340_v56 = vpop.f32.mrb[45].mxu1 }
0x19fe   :  { %v1914_v57 = vpop.f32.mrb[46].mxu1 }
0x19ff   :  { %2453 = vtanh.f32 %v1912_v32  ;;  %v2341_v58 = vpop.f32.mrb[47].mxu1 }
0x1a09   :  { %v2454_v59 = vpop.eup %2453 }
0x1a0a   :  { %v1922_v60 = vpack.c.bf16 %v2454_v59, %v2454_v59 }
0x1a0c   :  { %2347 = vmatmul.mubr.msk.bf16.vlgmr.msra.gmra.mrb[48].mxu1 %vm71_vm0, %v1922_v60 }
0x1adf   :  { %v1979_v61 = vpop.f32.mrb[48].mxu1 }
0x1ae0   :  { %v1980_v62 = vadd.f32 %v2096_v15, %v1979_v61  ;;  %v2348_v63 = vpop.f32.mrb[49].mxu1 }
0x1ae1   :  { %v1982_v0 = vpop.f32.mrb[50].mxu1 }
0x1ae2   :  { %1985 = vst [vmem:[#allocation2] sm:$0x3] %v1980_v62  ;;  %v2349_v1 = vpop.f32.mrb[51].mxu1 }
0x1ae3   :  { %2466 = shalt.err (!%p2463_p4)
}
0x1ae4   :  { %s2467_s19 = scalar_lea.hbm %s3037_s20, 32 }
0x1ae5   :  { %p2468_p5 = scmp.ne.s32.totalorder %s3037_s20, %s2467_s19  ;;  %p2471_p6 = scmp.lt.u32.totalorder %s2467_s19, %s3037_s20 }
0x1ae7   :  { %p2473_p7 = pnand %p2471_p6, %p2468_p5 }
0x1ae9   :  { %2476 = shalt.err (!%p2473_p7)
}
0x1aea   :  { %1995 = dma.vmem_to_hbm [thread:$0]  %s1993_s26, 32, %s3037_s20, [#allocation3]  }
0x1aeb   :  { %2477 = dma.done.wait [#allocation3], 32  }
0x1aec   :  { %2478 = vsyncadd [#allocation3], 4294967264 }
0x1aed   :  { %1999 = vsyncpa [#allocation3], 1 }

</bundles_post_ra>
